<compile_context>
chip_gen: v7x
topology: tpu7x:2x2x1
jax: 0.10.0
libtpu: 0.0.40
codegen_flags: <defaults>
</compile_context>

<pallas_src>
import math
import functools

import jax
import jax.numpy as jnp
from jax import lax
from jax.experimental import pallas as pl
from jax.experimental.pallas import tpu as pltpu


_VMEM_LIMIT = 32 * 1024 * 1024        # explicit scoped-VMEM budget (safe on all gens)
_NEG_INF = jnp.float32(-1e9)


def _pick_tile(dim, target, align):
    """Largest multiple of `align` dividing `dim` that is <= target; else full dim."""
    if dim <= target:
        return dim
    t = (target // align) * align
    while t >= align:
        if dim % t == 0:
            return t
        t -= align
    return dim


def _cparams(semantics):
    return pltpu.CompilerParams(dimension_semantics=semantics,
                                vmem_limit_bytes=_VMEM_LIMIT)


# ----------------------------- Pallas kernels -----------------------------

def _matmul_kernel(x_ref, w_ref, b_ref, o_ref, acc_ref):
    """Tiled out = x @ w + b with K-axis reduction into a f32 VMEM accumulator."""
    k = pl.program_id(2)

    @pl.when(k == 0)
    def _():
        acc_ref[...] = jnp.zeros_like(acc_ref)

    acc_ref[...] += jnp.dot(x_ref[...].astype(jnp.bfloat16), w_ref[...],
                            preferred_element_type=jnp.float32)

    @pl.when(k == pl.num_programs(2) - 1)
    def _():
        o_ref[...] = (acc_ref[...] + b_ref[...]).astype(o_ref.dtype)


def linear(x2d, w, b, out_dtype=jnp.float32):
    """x2d: (M, K) f32/bf16, w: (K, N) bf16, b: (N,) f32 -> (M, N)."""
    M, K = x2d.shape
    N = w.shape[1]
    tm = _pick_tile(M, 256, 8)
    tn = _pick_tile(N, 512, 128)
    tk = _pick_tile(K, 512, 128)
    return pl.pallas_call(
        _matmul_kernel,
        out_shape=jax.ShapeDtypeStruct((M, N), out_dtype),
        grid=(M // tm, N // tn, K // tk),
        in_specs=[pl.BlockSpec((tm, tk), lambda i, j, k: (i, k)),
                  pl.BlockSpec((tk, tn), lambda i, j, k: (k, j)),
                  pl.BlockSpec((1, tn), lambda i, j, k: (0, j))],
        out_specs=pl.BlockSpec((tm, tn), lambda i, j, k: (i, j)),
        scratch_shapes=[pltpu.VMEM((tm, tn), jnp.float32)],
        compiler_params=_cparams(("parallel", "parallel", "arbitrary")),
    )(x2d, w, b.reshape(1, N))


def _make_multi_proj_kernel(nproj):
    def kernel(*refs):
        x_ref = refs[0]
        w_refs = refs[1:1 + nproj]
        b_refs = refs[1 + nproj:1 + 2 * nproj]
        o_refs = refs[1 + 2 * nproj:]
        x = x_ref[...].astype(jnp.bfloat16)      # load x once, reuse for all projections
        for w_ref, b_ref, o_ref in zip(w_refs, b_refs, o_refs):
            y = jnp.dot(x, w_ref[...], preferred_element_type=jnp.float32) + b_ref[...]
            o_ref[...] = y.astype(o_ref.dtype)
    return kernel


def multi_linear(x2d, ws, bs, out_dtype=jnp.bfloat16):
    """Fused multi-projection: shares one load of x for several (x @ w_i + b_i)."""
    M, K = x2d.shape
    n = len(ws)
    Ns = [w.shape[1] for w in ws]
    tm = _pick_tile(M, 256, 8)

    in_specs = [pl.BlockSpec((tm, K), lambda i: (i, 0))]
    for w in ws:
        in_specs.append(pl.BlockSpec((K, w.shape[1]), lambda i: (0, 0)))
    for w in ws:
        in_specs.append(pl.BlockSpec((1, w.shape[1]), lambda i: (0, 0)))
    out_specs = [pl.BlockSpec((tm, N), lambda i: (i, 0)) for N in Ns]
    out_shape = [jax.ShapeDtypeStruct((M, N), out_dtype) for N in Ns]

    outs = pl.pallas_call(
        _make_multi_proj_kernel(n),
        out_shape=out_shape,
        grid=(M // tm,),
        in_specs=in_specs,
        out_specs=out_specs,
        compiler_params=_cparams(("parallel",)),
    )(x2d, *ws, *[b.reshape(1, -1) for b in bs])
    return tuple(outs)


def _mha_kernel(q_ref, k_ref, v_ref, bias_ref, o_ref, *, nhead, scale):
    """All heads of one (batch, query-tile). q: (tq, D), k/v: (Sk, D), bias: (tq, Sk)."""
    q = q_ref[...].astype(jnp.bfloat16)
    k = k_ref[...].astype(jnp.bfloat16)
    v = v_ref[...].astype(jnp.bfloat16)
    bias = bias_ref[...]                       # additive mask, f32
    D = q.shape[-1]
    dk = D // nhead
    dims = (((1,), (1,)), ((), ()))            # contract dk on both sides (no .T)

    outs = []
    for h in range(nhead):
        sl = slice(h * dk, (h + 1) * dk)
        s = lax.dot_general(q[:, sl], k[:, sl], dims,
                            preferred_element_type=jnp.float32) * scale
        s = s + bias
        m = jnp.max(s, axis=-1, keepdims=True)
        e = jnp.exp(s - m)
        denom = jnp.sum(e, axis=-1, keepdims=True)
        p = (e * pl.reciprocal(denom, approx=True)).astype(jnp.bfloat16)
        outs.append(jnp.dot(p, v[:, sl], preferred_element_type=jnp.float32))
    # single lane-dense (tq, D) store
    o_ref[...] = jnp.concatenate(outs, axis=-1).astype(o_ref.dtype)


def mha_attention(q, k, v, bias, nhead):
    """q: (B, Sq, D), k/v: (B, Sk, D), bias: (B, Sq, Sk) additive -> (B, Sq, D)."""
    B, Sq, D = q.shape
    Sk = k.shape[1]
    tq = _pick_tile(Sq, 256, 8)
    kern = functools.partial(_mha_kernel, nhead=nhead, scale=1.0 / math.sqrt(D // nhead))
    return pl.pallas_call(
        kern,
        out_shape=jax.ShapeDtypeStruct((B, Sq, D), jnp.bfloat16),
        grid=(B, Sq // tq),
        in_specs=[
            pl.BlockSpec((None, tq, D), lambda b, i: (b, i, 0)),
            pl.BlockSpec((None, Sk, D), lambda b, i: (b, 0, 0)),
            pl.BlockSpec((None, Sk, D), lambda b, i: (b, 0, 0)),
            pl.BlockSpec((None, tq, Sk), lambda b, i: (b, i, 0)),
        ],
        out_specs=pl.BlockSpec((None, tq, D), lambda b, i: (b, i, 0)),
        compiler_params=_cparams(("parallel", "parallel")),
    )(q, k, v, bias)


def _matmul_add_ln_kernel(x_ref, w_ref, b_ref, res_ref, g_ref, bln_ref, o_ref):
    """out = LayerNorm(res + x @ w + b)   (eps=1e-5, biased variance)."""
    y = jnp.dot(x_ref[...].astype(jnp.bfloat16), w_ref[...],
                preferred_element_type=jnp.float32) + b_ref[...]
    z = res_ref[...] + y
    mu = jnp.mean(z, axis=-1, keepdims=True)
    var = jnp.mean(jnp.square(z - mu), axis=-1, keepdims=True)
    o_ref[...] = ((z - mu) * lax.rsqrt(var + 1e-5) * g_ref[...] + bln_ref[...]
                  ).astype(o_ref.dtype)


def matmul_add_ln(x2d, w, b, res2d, gamma, beta):
    """Fused output-projection + residual add + LayerNorm."""
    M, K = x2d.shape
    N = w.shape[1]
    tm = _pick_tile(M, 256, 8)
    return pl.pallas_call(
        _matmul_add_ln_kernel,
        out_shape=jax.ShapeDtypeStruct((M, N), jnp.float32),
        grid=(M // tm,),
        in_specs=[pl.BlockSpec((tm, K), lambda i: (i, 0)),
                  pl.BlockSpec((K, N), lambda i: (0, 0)),
                  pl.BlockSpec((1, N), lambda i: (0, 0)),
                  pl.BlockSpec((tm, N), lambda i: (i, 0)),
                  pl.BlockSpec((1, N), lambda i: (0, 0)),
                  pl.BlockSpec((1, N), lambda i: (0, 0))],
        out_specs=pl.BlockSpec((tm, N), lambda i: (i, 0)),
        compiler_params=_cparams(("parallel",)),
    )(x2d, w, b.reshape(1, N), res2d, gamma.reshape(1, N), beta.reshape(1, N))


def _ffn_add_ln_kernel(x_ref, w1_ref, b1_ref, w2_ref, b2_ref, g_ref, bln_ref, o_ref):
    """out = LayerNorm(x + relu(x @ w1 + b1) @ w2 + b2)."""
    x = x_ref[...]
    h = jnp.dot(x.astype(jnp.bfloat16), w1_ref[...],
                preferred_element_type=jnp.float32) + b1_ref[...]
    h = jnp.maximum(h, 0.0)
    y = jnp.dot(h.astype(jnp.bfloat16), w2_ref[...],
                preferred_element_type=jnp.float32) + b2_ref[...]
    z = x + y
    mu = jnp.mean(z, axis=-1, keepdims=True)
    var = jnp.mean(jnp.square(z - mu), axis=-1, keepdims=True)
    o_ref[...] = ((z - mu) * lax.rsqrt(var + 1e-5) * g_ref[...] + bln_ref[...]
                  ).astype(o_ref.dtype)


def ffn_add_ln(x2d, w1, b1, w2, b2, gamma, beta):
    """Fused feed-forward + residual add + LayerNorm."""
    M, D = x2d.shape
    d_ff = w1.shape[1]
    tm = _pick_tile(M, 256, 8)
    return pl.pallas_call(
        _ffn_add_ln_kernel,
        out_shape=jax.ShapeDtypeStruct((M, D), jnp.float32),
        grid=(M // tm,),
        in_specs=[pl.BlockSpec((tm, D), lambda i: (i, 0)),
                  pl.BlockSpec((D, d_ff), lambda i: (0, 0)),
                  pl.BlockSpec((1, d_ff), lambda i: (0, 0)),
                  pl.BlockSpec((d_ff, D), lambda i: (0, 0)),
                  pl.BlockSpec((1, D), lambda i: (0, 0)),
                  pl.BlockSpec((1, D), lambda i: (0, 0)),
                  pl.BlockSpec((1, D), lambda i: (0, 0))],
        out_specs=pl.BlockSpec((tm, D), lambda i: (i, 0)),
        compiler_params=_cparams(("parallel",)),
    )(x2d, w1, b1.reshape(1, d_ff), w2, b2.reshape(1, D),
      gamma.reshape(1, D), beta.reshape(1, D))


# ----------------------------- Model composition -----------------------------

def self_attention_core(p, x, bias, nhead):
    """Fused QKV projection + multi-head attention (no output projection)."""
    B, S, D = x.shape
    q, k, v = multi_linear(x.reshape(-1, D),
                           [p["wq"], p["wk"], p["wv"]],
                           [p["bq"], p["bk"], p["bv"]])
    return mha_attention(q.reshape(B, S, D), k.reshape(B, S, D),
                         v.reshape(B, S, D), bias, nhead)


def cross_attention_core(p, x, enc_out, bias, nhead):
    """Q from x, fused KV projection from enc_out, then attention."""
    B, Sq, D = x.shape
    Sk = enc_out.shape[1]
    (q,) = multi_linear(x.reshape(-1, D), [p["wq"]], [p["bq"]])
    k, v = multi_linear(enc_out.reshape(-1, D), [p["wk"], p["wv"]], [p["bk"], p["bv"]])
    return mha_attention(q.reshape(B, Sq, D), k.reshape(B, Sk, D),
                         v.reshape(B, Sk, D), bias, nhead)


def encoder_layer(p, x, self_bias, nhead):
    B, S, D = x.shape
    a = self_attention_core(p["self_attn"], x, self_bias, nhead)
    x = matmul_add_ln(a.reshape(-1, D), p["self_attn"]["wo"], p["self_attn"]["bo"],
                      x.reshape(-1, D), p["ln1_g"], p["ln1_b"]).reshape(B, S, D)
    x = ffn_add_ln(x.reshape(-1, D), p["ff"]["w1"], p["ff"]["b1"],
                   p["ff"]["w2"], p["ff"]["b2"],
                   p["ln2_g"], p["ln2_b"]).reshape(B, S, D)
    return x


def decoder_layer(p, x, enc_out, cross_bias, self_bias, nhead):
    B, S, D = x.shape
    a = self_attention_core(p["self_attn"], x, self_bias, nhead)
    x = matmul_add_ln(a.reshape(-1, D), p["self_attn"]["wo"], p["self_attn"]["bo"],
                      x.reshape(-1, D), p["ln1_g"], p["ln1_b"]).reshape(B, S, D)
    a = cross_attention_core(p["cross_attn"], x, enc_out, cross_bias, nhead)
    x = matmul_add_ln(a.reshape(-1, D), p["cross_attn"]["wo"], p["cross_attn"]["bo"],
                      x.reshape(-1, D), p["ln2_g"], p["ln2_b"]).reshape(B, S, D)
    x = ffn_add_ln(x.reshape(-1, D), p["ff"]["w1"], p["ff"]["b1"],
                   p["ff"]["w2"], p["ff"]["b2"],
                   p["ln3_g"], p["ln3_b"]).reshape(B, S, D)
    return x


def positional_encoding_table(max_len, d_model):
    position = jnp.arange(max_len, dtype=jnp.float32)[:, None]
    div_term = jnp.exp(jnp.arange(0, d_model, 2, dtype=jnp.float32)
                       * (-math.log(10000.0) / d_model))
    pe = jnp.zeros((max_len, d_model), jnp.float32)
    pe = pe.at[:, 0::2].set(jnp.sin(position * div_term))
    pe = pe.at[:, 1::2].set(jnp.cos(position * div_term))
    return pe


def transformer_forward(params, src, tgt, cfg):
    B, S_src = src.shape
    _, S_tgt = tgt.shape
    nhead = cfg["nhead"]
    D = cfg["d_model"]

    # Additive masks (0 for keep, -1e9 for masked) — same semantics as generate_mask.
    src_keep = (src != 0)[:, None, :]                               # (B, 1, Ssrc)
    src_bias = jnp.where(src_keep, jnp.float32(0.0), _NEG_INF)      # (B, 1, Ssrc)
    enc_self_bias = jnp.broadcast_to(src_bias, (B, S_src, S_src))
    cross_bias = jnp.broadcast_to(src_bias, (B, S_tgt, S_src))
    causal = jnp.tril(jnp.ones((S_tgt, S_tgt), dtype=bool))[None]   # (1, S, S)
    tgt_keep = (tgt != 0)[:, :, None] & causal                      # (B, S, S)
    tgt_self_bias = jnp.where(tgt_keep, jnp.float32(0.0), _NEG_INF)

    pe = params["pe"]
    src_emb = jnp.take(params["enc_emb"], src, axis=0) + pe[None, :S_src, :]
    tgt_emb = jnp.take(params["dec_emb"], tgt, axis=0) + pe[None, :S_tgt, :]

    enc_out = src_emb
    for p in params["encoder_layers"]:
        enc_out = encoder_layer(p, enc_out, enc_self_bias, nhead)

    dec_out = tgt_emb
    for p in params["decoder_layers"]:
        dec_out = decoder_layer(p, dec_out, enc_out, cross_bias, tgt_self_bias, nhead)

    logits = linear(dec_out.reshape(-1, D), params["fc_w"], params["fc_b"])
    return logits.reshape(B, S_tgt, cfg["tgt_vocab_size"])


# ----------------------------- Parameter init -----------------------------

def _dense_init(key, fan_in, fan_out):
    k1, k2 = jax.random.split(key)
    bound = 1.0 / math.sqrt(fan_in)
    w = jax.random.uniform(k1, (fan_in, fan_out), jnp.float32, -bound, bound)
    b = jax.random.uniform(k2, (fan_out,), jnp.float32, -bound, bound)
    # matmul weights stored in bf16 (MXU operand dtype); biases stay f32.
    return w.astype(jnp.bfloat16), b


def _init_mha(key, d_model):
    ks = jax.random.split(key, 4)
    wq, bq = _dense_init(ks[0], d_model, d_model)
    wk, bk = _dense_init(ks[1], d_model, d_model)
    wv, bv = _dense_init(ks[2], d_model, d_model)
    wo, bo = _dense_init(ks[3], d_model, d_model)
    return dict(wq=wq, bq=bq, wk=wk, bk=bk, wv=wv, bv=bv, wo=wo, bo=bo)


def _init_ff(key, d_model, d_ff):
    k1, k2 = jax.random.split(key)
    w1, b1 = _dense_init(k1, d_model, d_ff)
    w2, b2 = _dense_init(k2, d_ff, d_model)
    return dict(w1=w1, b1=b1, w2=w2, b2=b2)


def _init_encoder_layer(key, d_model, d_ff):
    k1, k2 = jax.random.split(key)
    return dict(
        self_attn=_init_mha(k1, d_model),
        ff=_init_ff(k2, d_model, d_ff),
        ln1_g=jnp.ones((d_model,), jnp.float32), ln1_b=jnp.zeros((d_model,), jnp.float32),
        ln2_g=jnp.ones((d_model,), jnp.float32), ln2_b=jnp.zeros((d_model,), jnp.float32),
    )


def _init_decoder_layer(key, d_model, d_ff):
    k1, k2, k3 = jax.random.split(key, 3)
    return dict(
        self_attn=_init_mha(k1, d_model),
        cross_attn=_init_mha(k2, d_model),
        ff=_init_ff(k3, d_model, d_ff),
        ln1_g=jnp.ones((d_model,), jnp.float32), ln1_b=jnp.zeros((d_model,), jnp.float32),
        ln2_g=jnp.ones((d_model,), jnp.float32), ln2_b=jnp.zeros((d_model,), jnp.float32),
        ln3_g=jnp.ones((d_model,), jnp.float32), ln3_b=jnp.zeros((d_model,), jnp.float32),
    )


def init_transformer(key, cfg):
    D = cfg["d_model"]
    ks = jax.random.split(key, 5 + cfg["num_encoder_layers"] + cfg["num_decoder_layers"])
    params = dict(
        enc_emb=jax.random.normal(ks[0], (cfg["src_vocab_size"], D), jnp.float32),
        dec_emb=jax.random.normal(ks[1], (cfg["tgt_vocab_size"], D), jnp.float32),
        pe=positional_encoding_table(cfg["max_seq_length"], D),
    )
    fc_w, fc_b = _dense_init(ks[2], D, cfg["tgt_vocab_size"])
    params["fc_w"], params["fc_b"] = fc_w, fc_b
    params["encoder_layers"] = [
        _init_encoder_layer(ks[3 + i], D, cfg["d_ff"])
        for i in range(cfg["num_encoder_layers"])]
    params["decoder_layers"] = [
        _init_decoder_layer(ks[3 + cfg["num_encoder_layers"] + i], D, cfg["d_ff"])
        for i in range(cfg["num_decoder_layers"])]
    return params


# ----------------------------- Main -----------------------------

if __name__ == "__main__":
    cfg = dict(
        src_vocab_size=16,
        tgt_vocab_size=16,
        d_model=32,
        nhead=4,
        num_encoder_layers=2,
        num_decoder_layers=2,
        d_ff=64,
        max_seq_length=16,
    )
    B, S = 2, 8

    key = jax.random.PRNGKey(0)
    kp, ks, kt = jax.random.split(key, 3)
    params = init_transformer(kp, cfg)
    src = jax.random.randint(ks, (B, S), 1, cfg["src_vocab_size"], dtype=jnp.int32)
    tgt = jax.random.randint(kt, (B, S), 1, cfg["tgt_vocab_size"], dtype=jnp.int32)

    fwd = jax.jit(functools.partial(transformer_forward, cfg=cfg))
    out = fwd(params, src, tgt)
    out = jax.block_until_ready(out)

    assert out.shape == (B, S, cfg["tgt_vocab_size"]), out.shape
    assert out.dtype == jnp.float32
    assert bool(jnp.all(jnp.isfinite(out)))
    print("KERNEL_OK")
</pallas_src>

<mosaic_0001>
module attributes {stable_mosaic.version = 11 : i64} {
  func.func @kernel(%arg0: i32, %arg1: memref<16x32xf32, #tpu.memory_space<vmem>>, %arg2: memref<32x32xbf16, #tpu.memory_space<vmem>>, %arg3: memref<32x32xbf16, #tpu.memory_space<vmem>>, %arg4: memref<32x32xbf16, #tpu.memory_space<vmem>>, %arg5: memref<1x32xf32, #tpu.memory_space<vmem>>, %arg6: memref<1x32xf32, #tpu.memory_space<vmem>>, %arg7: memref<1x32xf32, #tpu.memory_space<vmem>>, %arg8: memref<16x32xbf16, #tpu.memory_space<vmem>>, %arg9: memref<16x32xbf16, #tpu.memory_space<vmem>>, %arg10: memref<16x32xbf16, #tpu.memory_space<vmem>>) attributes {dimension_semantics = [#tpu.dimension_semantics<parallel>], iteration_bounds = array<i64: 1>, scalar_prefetch = 0 : i64, scratch_operands = 0 : i64, tpu.core_type = #tpu.core_type<tc>, window_params = [{transform_indices = @transform_0, window_bounds = array<i64: 16, 32>}, {pipeline_mode = #tpu.pipeline_mode<synchronous>, transform_indices = @transform_1, window_bounds = array<i64: 32, 32>}, {pipeline_mode = #tpu.pipeline_mode<synchronous>, transform_indices = @transform_2, window_bounds = array<i64: 32, 32>}, {pipeline_mode = #tpu.pipeline_mode<synchronous>, transform_indices = @transform_3, window_bounds = array<i64: 32, 32>}, {pipeline_mode = #tpu.pipeline_mode<synchronous>, transform_indices = @transform_4, window_bounds = array<i64: 1, 32>}, {pipeline_mode = #tpu.pipeline_mode<synchronous>, transform_indices = @transform_5, window_bounds = array<i64: 1, 32>}, {pipeline_mode = #tpu.pipeline_mode<synchronous>, transform_indices = @transform_6, window_bounds = array<i64: 1, 32>}, {transform_indices = @transform_7, window_bounds = array<i64: 16, 32>}, {transform_indices = @transform_8, window_bounds = array<i64: 16, 32>}, {transform_indices = @transform_9, window_bounds = array<i64: 16, 32>}]} {
    %c0 = arith.constant 0 : index
    %c0_0 = arith.constant 0 : index
    %0 = vector.load %arg1[%c0, %c0_0] : memref<16x32xf32, #tpu.memory_space<vmem>>, vector<16x32xf32>
    %1 = arith.truncf %0 : vector<16x32xf32> to vector<16x32xbf16>
    %c0_1 = arith.constant 0 : index
    %c0_2 = arith.constant 0 : index
    %2 = vector.load %arg2[%c0_1, %c0_2] : memref<32x32xbf16, #tpu.memory_space<vmem>>, vector<32x32xbf16>
    %cst = arith.constant dense<0.000000e+00> : vector<16x32xf32>
    %3 = tpu.matmul %1, %2, %cst {dimension_numbers = #tpu.dot_dimension_numbers<[1], [0], [0], [1], [0, 0, 1, 1], [], []>} : vector<16x32xbf16>, vector<32x32xbf16>, vector<16x32xf32> -> vector<16x32xf32>
    %c0_3 = arith.constant 0 : index
    %c0_4 = arith.constant 0 : index
    %4 = vector.load %arg5[%c0_3, %c0_4] : memref<1x32xf32, #tpu.memory_space<vmem>>, vector<1x32xf32>
    %5 = vector.broadcast %4 : vector<1x32xf32> to vector<16x32xf32>
    %6 = arith.addf %3, %5 : vector<16x32xf32>
    %7 = arith.truncf %6 : vector<16x32xf32> to vector<16x32xbf16>
    %c0_5 = arith.constant 0 : index
    %c0_6 = arith.constant 0 : index
    %8 = vector.load %arg8[%c0_5, %c0_6] : memref<16x32xbf16, #tpu.memory_space<vmem>>, vector<16x32xbf16>
    tpu.vector_store %arg8[%c0_5, %c0_6], %7 {strides = array<i32>} : memref<16x32xbf16, #tpu.memory_space<vmem>>, vector<16x32xbf16>,
    %c0_7 = arith.constant 0 : index
    %c0_8 = arith.constant 0 : index
    %9 = vector.load %arg3[%c0_7, %c0_8] : memref<32x32xbf16, #tpu.memory_space<vmem>>, vector<32x32xbf16>
    %cst_9 = arith.constant dense<0.000000e+00> : vector<16x32xf32>
    %10 = tpu.matmul %1, %9, %cst_9 {dimension_numbers = #tpu.dot_dimension_numbers<[1], [0], [0], [1], [0, 0, 1, 1], [], []>} : vector<16x32xbf16>, vector<32x32xbf16>, vector<16x32xf32> -> vector<16x32xf32>
    %c0_10 = arith.constant 0 : index
    %c0_11 = arith.constant 0 : index
    %11 = vector.load %arg6[%c0_10, %c0_11] : memref<1x32xf32, #tpu.memory_space<vmem>>, vector<1x32xf32>
    %12 = vector.broadcast %11 : vector<1x32xf32> to vector<16x32xf32>
    %13 = arith.addf %10, %12 : vector<16x32xf32>
    %14 = arith.truncf %13 : vector<16x32xf32> to vector<16x32xbf16>
    %c0_12 = arith.constant 0 : index
    %c0_13 = arith.constant 0 : index
    %15 = vector.load %arg9[%c0_12, %c0_13] : memref<16x32xbf16, #tpu.memory_space<vmem>>, vector<16x32xbf16>
    tpu.vector_store %arg9[%c0_12, %c0_13], %14 {strides = array<i32>} : memref<16x32xbf16, #tpu.memory_space<vmem>>, vector<16x32xbf16>,
    %c0_14 = arith.constant 0 : index
    %c0_15 = arith.constant 0 : index
    %16 = vector.load %arg4[%c0_14, %c0_15] : memref<32x32xbf16, #tpu.memory_space<vmem>>, vector<32x32xbf16>
    %cst_16 = arith.constant dense<0.000000e+00> : vector<16x32xf32>
    %17 = tpu.matmul %1, %16, %cst_16 {dimension_numbers = #tpu.dot_dimension_numbers<[1], [0], [0], [1], [0, 0, 1, 1], [], []>} : vector<16x32xbf16>, vector<32x32xbf16>, vector<16x32xf32> -> vector<16x32xf32>
    %c0_17 = arith.constant 0 : index
    %c0_18 = arith.constant 0 : index
    %18 = vector.load %arg7[%c0_17, %c0_18] : memref<1x32xf32, #tpu.memory_space<vmem>>, vector<1x32xf32>
    %19 = vector.broadcast %18 : vector<1x32xf32> to vector<16x32xf32>
    %20 = arith.addf %17, %19 : vector<16x32xf32>
    %21 = arith.truncf %20 : vector<16x32xf32> to vector<16x32xbf16>
    %c0_19 = arith.constant 0 : index
    %c0_20 = arith.constant 0 : index
    %22 = vector.load %arg10[%c0_19, %c0_20] : memref<16x32xbf16, #tpu.memory_space<vmem>>, vector<16x32xbf16>
    tpu.vector_store %arg10[%c0_19, %c0_20], %21 {strides = array<i32>} : memref<16x32xbf16, #tpu.memory_space<vmem>>, vector<16x32xbf16>,
    return
  }
  func.func @transform_0(%arg0: i32) -> (i32, i32) {
    %c0_i32 = arith.constant 0 : i32
    %c0_i32_0 = arith.constant 0 : i32
    return %arg0, %c0_i32 : i32, i32
  }
  func.func @transform_1(%arg0: i32) -> (i32, i32) {
    %c0_i32 = arith.constant 0 : i32
    %c0_i32_0 = arith.constant 0 : i32
    %c0_i32_1 = arith.constant 0 : i32
    return %c0_i32, %c0_i32_0 : i32, i32
  }
  func.func @transform_2(%arg0: i32) -> (i32, i32) {
    %c0_i32 = arith.constant 0 : i32
    %c0_i32_0 = arith.constant 0 : i32
    %c0_i32_1 = arith.constant 0 : i32
    return %c0_i32, %c0_i32_0 : i32, i32
  }
  func.func @transform_3(%arg0: i32) -> (i32, i32) {
    %c0_i32 = arith.constant 0 : i32
    %c0_i32_0 = arith.constant 0 : i32
    %c0_i32_1 = arith.constant 0 : i32
    return %c0_i32, %c0_i32_0 : i32, i32
  }
  func.func @transform_4(%arg0: i32) -> (i32, i32) {
    %c0_i32 = arith.constant 0 : i32
    %c0_i32_0 = arith.constant 0 : i32
    %c0_i32_1 = arith.constant 0 : i32
    return %c0_i32, %c0_i32_0 : i32, i32
  }
  func.func @transform_5(%arg0: i32) -> (i32, i32) {
    %c0_i32 = arith.constant 0 : i32
    %c0_i32_0 = arith.constant 0 : i32
    %c0_i32_1 = arith.constant 0 : i32
    return %c0_i32, %c0_i32_0 : i32, i32
  }
  func.func @transform_6(%arg0: i32) -> (i32, i32) {
    %c0_i32 = arith.constant 0 : i32
    %c0_i32_0 = arith.constant 0 : i32
    %c0_i32_1 = arith.constant 0 : i32
    return %c0_i32, %c0_i32_0 : i32, i32
  }
  func.func @transform_7(%arg0: i32) -> (i32, i32) {
    %c0_i32 = arith.constant 0 : i32
    %c0_i32_0 = arith.constant 0 : i32
    return %arg0, %c0_i32 : i32, i32
  }
  func.func @transform_8(%arg0: i32) -> (i32, i32) {
    %c0_i32 = arith.constant 0 : i32
    %c0_i32_0 = arith.constant 0 : i32
    return %arg0, %c0_i32 : i32, i32
  }
  func.func @transform_9(%arg0: i32) -> (i32, i32) {
    %c0_i32 = arith.constant 0 : i32
    %c0_i32_0 = arith.constant 0 : i32
    return %arg0, %c0_i32 : i32, i32
  }
}

module attributes {stable_mosaic.version = 11 : i64} {
  func.func @_matmul_add_ln_kernel(%arg0: i32, %arg1: memref<16x32xbf16, #tpu.memory_space<vmem>>, %arg2: memref<32x32xbf16, #tpu.memory_space<vmem>>, %arg3: memref<1x32xf32, #tpu.memory_space<vmem>>, %arg4: memref<16x32xf32, #tpu.memory_space<vmem>>, %arg5: memref<1x32xf32, #tpu.memory_space<vmem>>, %arg6: memref<1x32xf32, #tpu.memory_space<vmem>>, %arg7: memref<16x32xf32, #tpu.memory_space<vmem>>) attributes {dimension_semantics = [#tpu.dimension_semantics<parallel>], iteration_bounds = array<i64: 1>, scalar_prefetch = 0 : i64, scratch_operands = 0 : i64, tpu.core_type = #tpu.core_type<tc>, window_params = [{transform_indices = @transform_0, window_bounds = array<i64: 16, 32>}, {pipeline_mode = #tpu.pipeline_mode<synchronous>, transform_indices = @transform_1, window_bounds = array<i64: 32, 32>}, {pipeline_mode = #tpu.pipeline_mode<synchronous>, transform_indices = @transform_2, window_bounds = array<i64: 1, 32>}, {transform_indices = @transform_3, window_bounds = array<i64: 16, 32>}, {pipeline_mode = #tpu.pipeline_mode<synchronous>, transform_indices = @transform_4, window_bounds = array<i64: 1, 32>}, {pipeline_mode = #tpu.pipeline_mode<synchronous>, transform_indices = @transform_5, window_bounds = array<i64: 1, 32>}, {transform_indices = @transform_6, window_bounds = array<i64: 16, 32>}]} {
    %c0 = arith.constant 0 : index
    %c0_0 = arith.constant 0 : index
    %0 = vector.load %arg1[%c0, %c0_0] : memref<16x32xbf16, #tpu.memory_space<vmem>>, vector<16x32xbf16>
    %c0_1 = arith.constant 0 : index
    %c0_2 = arith.constant 0 : index
    %1 = vector.load %arg2[%c0_1, %c0_2] : memref<32x32xbf16, #tpu.memory_space<vmem>>, vector<32x32xbf16>
    %cst = arith.constant dense<0.000000e+00> : vector<16x32xf32>
    %2 = tpu.matmul %0, %1, %cst {dimension_numbers = #tpu.dot_dimension_numbers<[1], [0], [0], [1], [0, 0, 1, 1], [], []>} : vector<16x32xbf16>, vector<32x32xbf16>, vector<16x32xf32> -> vector<16x32xf32>
    %c0_3 = arith.constant 0 : index
    %c0_4 = arith.constant 0 : index
    %3 = vector.load %arg3[%c0_3, %c0_4] : memref<1x32xf32, #tpu.memory_space<vmem>>, vector<1x32xf32>
    %4 = vector.broadcast %3 : vector<1x32xf32> to vector<16x32xf32>
    %5 = arith.addf %2, %4 : vector<16x32xf32>
    %c0_5 = arith.constant 0 : index
    %c0_6 = arith.constant 0 : index
    %6 = vector.load %arg4[%c0_5, %c0_6] : memref<16x32xf32, #tpu.memory_space<vmem>>, vector<16x32xf32>
    %7 = arith.addf %6, %5 : vector<16x32xf32>
    %cst_7 = arith.constant dense<0.000000e+00> : vector<16xf32>
    %8 = vector.multi_reduction <add>, %7, %cst_7 [1] : vector<16x32xf32> to vector<16xf32>
    %9 = vector.shape_cast %8 : vector<16xf32> to vector<16x1xf32>
    %cst_8 = arith.constant 3.200000e+01 : f32
    %10 = vector.broadcast %cst_8 : f32 to vector<16x1xf32>
    %11 = arith.divf %9, %10 : vector<16x1xf32>
    %12 = vector.broadcast %11 : vector<16x1xf32> to vector<16x32xf32>
    %13 = arith.subf %7, %12 : vector<16x32xf32>
    %14 = arith.mulf %13, %13 : vector<16x32xf32>
    %cst_9 = arith.constant dense<0.000000e+00> : vector<16xf32>
    %15 = vector.multi_reduction <add>, %14, %cst_9 [1] : vector<16x32xf32> to vector<16xf32>
    %16 = vector.shape_cast %15 : vector<16xf32> to vector<16x1xf32>
    %cst_10 = arith.constant 3.200000e+01 : f32
    %17 = vector.broadcast %cst_10 : f32 to vector<16x1xf32>
    %18 = arith.divf %16, %17 : vector<16x1xf32>
    %19 = vector.broadcast %11 : vector<16x1xf32> to vector<16x32xf32>
    %20 = arith.subf %7, %19 : vector<16x32xf32>
    %cst_11 = arith.constant 9.99999974E-6 : f32
    %21 = vector.broadcast %cst_11 : f32 to vector<16x1xf32>
    %22 = arith.addf %18, %21 : vector<16x1xf32>
    %23 = math.rsqrt %22 : vector<16x1xf32>
    %24 = vector.broadcast %23 : vector<16x1xf32> to vector<16x32xf32>
    %25 = arith.mulf %20, %24 : vector<16x32xf32>
    %c0_12 = arith.constant 0 : index
    %c0_13 = arith.constant 0 : index
    %26 = vector.load %arg5[%c0_12, %c0_13] : memref<1x32xf32, #tpu.memory_space<vmem>>, vector<1x32xf32>
    %27 = vector.broadcast %26 : vector<1x32xf32> to vector<16x32xf32>
    %28 = arith.mulf %25, %27 : vector<16x32xf32>
    %c0_14 = arith.constant 0 : index
    %c0_15 = arith.constant 0 : index
    %29 = vector.load %arg6[%c0_14, %c0_15] : memref<1x32xf32, #tpu.memory_space<vmem>>, vector<1x32xf32>
    %30 = vector.broadcast %29 : vector<1x32xf32> to vector<16x32xf32>
    %31 = arith.addf %28, %30 : vector<16x32xf32>
    %c0_16 = arith.constant 0 : index
    %c0_17 = arith.constant 0 : index
    %32 = vector.load %arg7[%c0_16, %c0_17] : memref<16x32xf32, #tpu.memory_space<vmem>>, vector<16x32xf32>
    tpu.vector_store %arg7[%c0_16, %c0_17], %31 {strides = array<i32>} : memref<16x32xf32, #tpu.memory_space<vmem>>, vector<16x32xf32>,
    return
  }
  func.func @transform_0(%arg0: i32) -> (i32, i32) {
    %c0_i32 = arith.constant 0 : i32
    %c0_i32_0 = arith.constant 0 : i32
    return %arg0, %c0_i32 : i32, i32
  }
  func.func @transform_1(%arg0: i32) -> (i32, i32) {
    %c0_i32 = arith.constant 0 : i32
    %c0_i32_0 = arith.constant 0 : i32
    %c0_i32_1 = arith.constant 0 : i32
    return %c0_i32, %c0_i32_0 : i32, i32
  }
  func.func @transform_2(%arg0: i32) -> (i32, i32) {
    %c0_i32 = arith.constant 0 : i32
    %c0_i32_0 = arith.constant 0 : i32
    %c0_i32_1 = arith.constant 0 : i32
    return %c0_i32, %c0_i32_0 : i32, i32
  }
  func.func @transform_3(%arg0: i32) -> (i32, i32) {
    %c0_i32 = arith.constant 0 : i32
    %c0_i32_0 = arith.constant 0 : i32
    return %arg0, %c0_i32 : i32, i32
  }
  func.func @transform_4(%arg0: i32) -> (i32, i32) {
    %c0_i32 = arith.constant 0 : i32
    %c0_i32_0 = arith.constant 0 : i32
    %c0_i32_1 = arith.constant 0 : i32
    return %c0_i32, %c0_i32_0 : i32, i32
  }
  func.func @transform_5(%arg0: i32) -> (i32, i32) {
    %c0_i32 = arith.constant 0 : i32
    %c0_i32_0 = arith.constant 0 : i32
    %c0_i32_1 = arith.constant 0 : i32
    return %c0_i32, %c0_i32_0 : i32, i32
  }
  func.func @transform_6(%arg0: i32) -> (i32, i32) {
    %c0_i32 = arith.constant 0 : i32
    %c0_i32_0 = arith.constant 0 : i32
    return %arg0, %c0_i32 : i32, i32
  }
}

module attributes {stable_mosaic.version = 11 : i64} {
  func.func @_mha_kernel(%arg0: i32, %arg1: i32, %arg2: memref<1x8x32xbf16, #tpu.memory_space<vmem>>, %arg3: memref<1x8x32xbf16, #tpu.memory_space<vmem>>, %arg4: memref<1x8x32xbf16, #tpu.memory_space<vmem>>, %arg5: memref<1x8x8xf32, #tpu.memory_space<vmem>>, %arg6: memref<1x8x32xbf16, #tpu.memory_space<vmem>>) attributes {dimension_semantics = [#tpu.dimension_semantics<parallel>, #tpu.dimension_semantics<parallel>], iteration_bounds = array<i64: 2, 1>, scalar_prefetch = 0 : i64, scratch_operands = 0 : i64, tpu.core_type = #tpu.core_type<tc>, window_params = [{transform_indices = @transform_0, window_bounds = array<i64: 1, 8, 32>}, {transform_indices = @transform_1, window_bounds = array<i64: 1, 8, 32>}, {transform_indices = @transform_2, window_bounds = array<i64: 1, 8, 32>}, {transform_indices = @transform_3, window_bounds = array<i64: 1, 8, 8>}, {transform_indices = @transform_4, window_bounds = array<i64: 1, 8, 32>}]} {
    %c0 = arith.constant 0 : index
    %c0_0 = arith.constant 0 : index
    %c0_1 = arith.constant 0 : index
    %0 = vector.load %arg2[%c0, %c0_0, %c0_1] : memref<1x8x32xbf16, #tpu.memory_space<vmem>>, vector<1x8x32xbf16>
    %1 = vector.shape_cast %0 : vector<1x8x32xbf16> to vector<8x32xbf16>
    %c0_2 = arith.constant 0 : index
    %c0_3 = arith.constant 0 : index
    %c0_4 = arith.constant 0 : index
    %2 = vector.load %arg3[%c0_2, %c0_3, %c0_4] : memref<1x8x32xbf16, #tpu.memory_space<vmem>>, vector<1x8x32xbf16>
    %3 = vector.shape_cast %2 : vector<1x8x32xbf16> to vector<8x32xbf16>
    %c0_5 = arith.constant 0 : index
    %c0_6 = arith.constant 0 : index
    %c0_7 = arith.constant 0 : index
    %4 = vector.load %arg4[%c0_5, %c0_6, %c0_7] : memref<1x8x32xbf16, #tpu.memory_space<vmem>>, vector<1x8x32xbf16>
    %5 = vector.shape_cast %4 : vector<1x8x32xbf16> to vector<8x32xbf16>
    %c0_8 = arith.constant 0 : index
    %c0_9 = arith.constant 0 : index
    %c0_10 = arith.constant 0 : index
    %6 = vector.load %arg5[%c0_8, %c0_9, %c0_10] : memref<1x8x8xf32, #tpu.memory_space<vmem>>, vector<1x8x8xf32>
    %7 = vector.shape_cast %6 : vector<1x8x8xf32> to vector<8x8xf32>
    %8 = vector.extract_strided_slice %1 {offsets = [0, 0], sizes = [8, 8], strides = [1, 1]} : vector<8x32xbf16> to vector<8x8xbf16>
    %9 = vector.extract_strided_slice %3 {offsets = [0, 0], sizes = [8, 8], strides = [1, 1]} : vector<8x32xbf16> to vector<8x8xbf16>
    %cst = arith.constant dense<0.000000e+00> : vector<8x8xf32>
    %10 = tpu.matmul %8, %9, %cst {dimension_numbers = #tpu.dot_dimension_numbers<[1], [1], [0], [0], [0, 0, 1, 0], [], []>} : vector<8x8xbf16>, vector<8x8xbf16>, vector<8x8xf32> -> vector<8x8xf32>
    %cst_11 = arith.constant 0.353553385 : f32
    %11 = vector.broadcast %cst_11 : f32 to vector<8x8xf32>
    %12 = arith.mulf %10, %11 : vector<8x8xf32>
    %13 = arith.addf %12, %7 : vector<8x8xf32>
    %cst_12 = arith.constant dense<0xFF800000> : vector<8xf32>
    %14 = vector.multi_reduction <maximumf>, %13, %cst_12 [1] : vector<8x8xf32> to vector<8xf32>
    %15 = vector.shape_cast %14 : vector<8xf32> to vector<8x1xf32>
    %16 = vector.broadcast %15 : vector<8x1xf32> to vector<8x8xf32>
    %17 = arith.subf %13, %16 : vector<8x8xf32>
    %18 = math.exp %17 : vector<8x8xf32>
    %cst_13 = arith.constant dense<0.000000e+00> : vector<8xf32>
    %19 = vector.multi_reduction <add>, %18, %cst_13 [1] : vector<8x8xf32> to vector<8xf32>
    %20 = vector.shape_cast %19 : vector<8xf32> to vector<8x1xf32>
    %21 = tpu.reciprocal %20 {approx = true} : vector<8x1xf32> -> vector<8x1xf32>
    %22 = vector.broadcast %21 : vector<8x1xf32> to vector<8x8xf32>
    %23 = arith.mulf %18, %22 : vector<8x8xf32>
    %24 = arith.truncf %23 : vector<8x8xf32> to vector<8x8xbf16>
    %25 = vector.extract_strided_slice %5 {offsets = [0, 0], sizes = [8, 8], strides = [1, 1]} : vector<8x32xbf16> to vector<8x8xbf16>
    %cst_14 = arith.constant dense<0.000000e+00> : vector<8x8xf32>
    %26 = tpu.matmul %24, %25, %cst_14 {dimension_numbers = #tpu.dot_dimension_numbers<[1], [0], [0], [1], [0, 0, 1, 1], [], []>} : vector<8x8xbf16>, vector<8x8xbf16>, vector<8x8xf32> -> vector<8x8xf32>
    %27 = vector.extract_strided_slice %1 {offsets = [0, 8], sizes = [8, 8], strides = [1, 1]} : vector<8x32xbf16> to vector<8x8xbf16>
    %28 = vector.extract_strided_slice %3 {offsets = [0, 8], sizes = [8, 8], strides = [1, 1]} : vector<8x32xbf16> to vector<8x8xbf16>
    %cst_15 = arith.constant dense<0.000000e+00> : vector<8x8xf32>
    %29 = tpu.matmul %27, %28, %cst_15 {dimension_numbers = #tpu.dot_dimension_numbers<[1], [1], [0], [0], [0, 0, 1, 0], [], []>} : vector<8x8xbf16>, vector<8x8xbf16>, vector<8x8xf32> -> vector<8x8xf32>
    %cst_16 = arith.constant 0.353553385 : f32
    %30 = vector.broadcast %cst_16 : f32 to vector<8x8xf32>
    %31 = arith.mulf %29, %30 : vector<8x8xf32>
    %32 = arith.addf %31, %7 : vector<8x8xf32>
    %cst_17 = arith.constant dense<0xFF800000> : vector<8xf32>
    %33 = vector.multi_reduction <maximumf>, %32, %cst_17 [1] : vector<8x8xf32> to vector<8xf32>
    %34 = vector.shape_cast %33 : vector<8xf32> to vector<8x1xf32>
    %35 = vector.broadcast %34 : vector<8x1xf32> to vector<8x8xf32>
    %36 = arith.subf %32, %35 : vector<8x8xf32>
    %37 = math.exp %36 : vector<8x8xf32>
    %cst_18 = arith.constant dense<0.000000e+00> : vector<8xf32>
    %38 = vector.multi_reduction <add>, %37, %cst_18 [1] : vector<8x8xf32> to vector<8xf32>
    %39 = vector.shape_cast %38 : vector<8xf32> to vector<8x1xf32>
    %40 = tpu.reciprocal %39 {approx = true} : vector<8x1xf32> -> vector<8x1xf32>
    %41 = vector.broadcast %40 : vector<8x1xf32> to vector<8x8xf32>
    %42 = arith.mulf %37, %41 : vector<8x8xf32>
    %43 = arith.truncf %42 : vector<8x8xf32> to vector<8x8xbf16>
    %44 = vector.extract_strided_slice %5 {offsets = [0, 8], sizes = [8, 8], strides = [1, 1]} : vector<8x32xbf16> to vector<8x8xbf16>
    %cst_19 = arith.constant dense<0.000000e+00> : vector<8x8xf32>
    %45 = tpu.matmul %43, %44, %cst_19 {dimension_numbers = #tpu.dot_dimension_numbers<[1], [0], [0], [1], [0, 0, 1, 1], [], []>} : vector<8x8xbf16>, vector<8x8xbf16>, vector<8x8xf32> -> vector<8x8xf32>
    %46 = vector.extract_strided_slice %1 {offsets = [0, 16], sizes = [8, 8], strides = [1, 1]} : vector<8x32xbf16> to vector<8x8xbf16>
    %47 = vector.extract_strided_slice %3 {offsets = [0, 16], sizes = [8, 8], strides = [1, 1]} : vector<8x32xbf16> to vector<8x8xbf16>
    %cst_20 = arith.constant dense<0.000000e+00> : vector<8x8xf32>
    %48 = tpu.matmul %46, %47, %cst_20 {dimension_numbers = #tpu.dot_dimension_numbers<[1], [1], [0], [0], [0, 0, 1, 0], [], []>} : vector<8x8xbf16>, vector<8x8xbf16>, vector<8x8xf32> -> vector<8x8xf32>
    %cst_21 = arith.constant 0.353553385 : f32
    %49 = vector.broadcast %cst_21 : f32 to vector<8x8xf32>
    %50 = arith.mulf %48, %49 : vector<8x8xf32>
    %51 = arith.addf %50, %7 : vector<8x8xf32>
    %cst_22 = arith.constant dense<0xFF800000> : vector<8xf32>
    %52 = vector.multi_reduction <maximumf>, %51, %cst_22 [1] : vector<8x8xf32> to vector<8xf32>
    %53 = vector.shape_cast %52 : vector<8xf32> to vector<8x1xf32>
    %54 = vector.broadcast %53 : vector<8x1xf32> to vector<8x8xf32>
    %55 = arith.subf %51, %54 : vector<8x8xf32>
    %56 = math.exp %55 : vector<8x8xf32>
    %cst_23 = arith.constant dense<0.000000e+00> : vector<8xf32>
    %57 = vector.multi_reduction <add>, %56, %cst_23 [1] : vector<8x8xf32> to vector<8xf32>
    %58 = vector.shape_cast %57 : vector<8xf32> to vector<8x1xf32>
    %59 = tpu.reciprocal %58 {approx = true} : vector<8x1xf32> -> vector<8x1xf32>
    %60 = vector.broadcast %59 : vector<8x1xf32> to vector<8x8xf32>
    %61 = arith.mulf %56, %60 : vector<8x8xf32>
    %62 = arith.truncf %61 : vector<8x8xf32> to vector<8x8xbf16>
    %63 = vector.extract_strided_slice %5 {offsets = [0, 16], sizes = [8, 8], strides = [1, 1]} : vector<8x32xbf16> to vector<8x8xbf16>
    %cst_24 = arith.constant dense<0.000000e+00> : vector<8x8xf32>
    %64 = tpu.matmul %62, %63, %cst_24 {dimension_numbers = #tpu.dot_dimension_numbers<[1], [0], [0], [1], [0, 0, 1, 1], [], []>} : vector<8x8xbf16>, vector<8x8xbf16>, vector<8x8xf32> -> vector<8x8xf32>
    %65 = vector.extract_strided_slice %1 {offsets = [0, 24], sizes = [8, 8], strides = [1, 1]} : vector<8x32xbf16> to vector<8x8xbf16>
    %66 = vector.extract_strided_slice %3 {offsets = [0, 24], sizes = [8, 8], strides = [1, 1]} : vector<8x32xbf16> to vector<8x8xbf16>
    %cst_25 = arith.constant dense<0.000000e+00> : vector<8x8xf32>
    %67 = tpu.matmul %65, %66, %cst_25 {dimension_numbers = #tpu.dot_dimension_numbers<[1], [1], [0], [0], [0, 0, 1, 0], [], []>} : vector<8x8xbf16>, vector<8x8xbf16>, vector<8x8xf32> -> vector<8x8xf32>
    %cst_26 = arith.constant 0.353553385 : f32
    %68 = vector.broadcast %cst_26 : f32 to vector<8x8xf32>
    %69 = arith.mulf %67, %68 : vector<8x8xf32>
    %70 = arith.addf %69, %7 : vector<8x8xf32>
    %cst_27 = arith.constant dense<0xFF800000> : vector<8xf32>
    %71 = vector.multi_reduction <maximumf>, %70, %cst_27 [1] : vector<8x8xf32> to vector<8xf32>
    %72 = vector.shape_cast %71 : vector<8xf32> to vector<8x1xf32>
    %73 = vector.broadcast %72 : vector<8x1xf32> to vector<8x8xf32>
    %74 = arith.subf %70, %73 : vector<8x8xf32>
    %75 = math.exp %74 : vector<8x8xf32>
    %cst_28 = arith.constant dense<0.000000e+00> : vector<8xf32>
    %76 = vector.multi_reduction <add>, %75, %cst_28 [1] : vector<8x8xf32> to vector<8xf32>
    %77 = vector.shape_cast %76 : vector<8xf32> to vector<8x1xf32>
    %78 = tpu.reciprocal %77 {approx = true} : vector<8x1xf32> -> vector<8x1xf32>
    %79 = vector.broadcast %78 : vector<8x1xf32> to vector<8x8xf32>
    %80 = arith.mulf %75, %79 : vector<8x8xf32>
    %81 = arith.truncf %80 : vector<8x8xf32> to vector<8x8xbf16>
    %82 = vector.extract_strided_slice %5 {offsets = [0, 24], sizes = [8, 8], strides = [1, 1]} : vector<8x32xbf16> to vector<8x8xbf16>
    %cst_29 = arith.constant dense<0.000000e+00> : vector<8x8xf32>
    %83 = tpu.matmul %81, %82, %cst_29 {dimension_numbers = #tpu.dot_dimension_numbers<[1], [0], [0], [1], [0, 0, 1, 1], [], []>} : vector<8x8xbf16>, vector<8x8xbf16>, vector<8x8xf32> -> vector<8x8xf32>
    %84 = tpu.concatenate %26, %45, %64, %83 in 1 : vector<8x8xf32>, vector<8x8xf32>, vector<8x8xf32>, vector<8x8xf32> -> vector<8x32xf32>
    %85 = arith.truncf %84 : vector<8x32xf32> to vector<8x32xbf16>
    %c0_30 = arith.constant 0 : index
    %c0_31 = arith.constant 0 : index
    %c0_32 = arith.constant 0 : index
    %86 = vector.load %arg6[%c0_30, %c0_31, %c0_32] : memref<1x8x32xbf16, #tpu.memory_space<vmem>>, vector<1x8x32xbf16>
    %87 = vector.shape_cast %86 : vector<1x8x32xbf16> to vector<8x32xbf16>
    %88 = vector.shape_cast %85 : vector<8x32xbf16> to vector<1x8x32xbf16>
    tpu.vector_store %arg6[%c0_30, %c0_31, %c0_32], %88 {strides = array<i32>} : memref<1x8x32xbf16, #tpu.memory_space<vmem>>, vector<1x8x32xbf16>,
    return
  }
  func.func @transform_0(%arg0: i32, %arg1: i32) -> (i32, i32, i32) {
    %c0_i32 = arith.constant 0 : i32
    %c0_i32_0 = arith.constant 0 : i32
    return %arg0, %arg1, %c0_i32 : i32, i32, i32
  }
  func.func @transform_1(%arg0: i32, %arg1: i32) -> (i32, i32, i32) {
    %c0_i32 = arith.constant 0 : i32
    %c0_i32_0 = arith.constant 0 : i32
    %c0_i32_1 = arith.constant 0 : i32
    return %arg0, %c0_i32, %c0_i32_0 : i32, i32, i32
  }
  func.func @transform_2(%arg0: i32, %arg1: i32) -> (i32, i32, i32) {
    %c0_i32 = arith.constant 0 : i32
    %c0_i32_0 = arith.constant 0 : i32
    %c0_i32_1 = arith.constant 0 : i32
    return %arg0, %c0_i32, %c0_i32_0 : i32, i32, i32
  }
  func.func @transform_3(%arg0: i32, %arg1: i32) -> (i32, i32, i32) {
    %c0_i32 = arith.constant 0 : i32
    %c0_i32_0 = arith.constant 0 : i32
    return %arg0, %arg1, %c0_i32 : i32, i32, i32
  }
  func.func @transform_4(%arg0: i32, %arg1: i32) -> (i32, i32, i32) {
    %c0_i32 = arith.constant 0 : i32
    %c0_i32_0 = arith.constant 0 : i32
    return %arg0, %arg1, %c0_i32 : i32, i32, i32
  }
}

module attributes {stable_mosaic.version = 11 : i64} {
  func.func @_ffn_add_ln_kernel(%arg0: i32, %arg1: memref<16x32xf32, #tpu.memory_space<vmem>>, %arg2: memref<32x64xbf16, #tpu.memory_space<vmem>>, %arg3: memref<1x64xf32, #tpu.memory_space<vmem>>, %arg4: memref<64x32xbf16, #tpu.memory_space<vmem>>, %arg5: memref<1x32xf32, #tpu.memory_space<vmem>>, %arg6: memref<1x32xf32, #tpu.memory_space<vmem>>, %arg7: memref<1x32xf32, #tpu.memory_space<vmem>>, %arg8: memref<16x32xf32, #tpu.memory_space<vmem>>) attributes {dimension_semantics = [#tpu.dimension_semantics<parallel>], iteration_bounds = array<i64: 1>, scalar_prefetch = 0 : i64, scratch_operands = 0 : i64, tpu.core_type = #tpu.core_type<tc>, window_params = [{transform_indices = @transform_0, window_bounds = array<i64: 16, 32>}, {pipeline_mode = #tpu.pipeline_mode<synchronous>, transform_indices = @transform_1, window_bounds = array<i64: 32, 64>}, {pipeline_mode = #tpu.pipeline_mode<synchronous>, transform_indices = @transform_2, window_bounds = array<i64: 1, 64>}, {pipeline_mode = #tpu.pipeline_mode<synchronous>, transform_indices = @transform_3, window_bounds = array<i64: 64, 32>}, {pipeline_mode = #tpu.pipeline_mode<synchronous>, transform_indices = @transform_4, window_bounds = array<i64: 1, 32>}, {pipeline_mode = #tpu.pipeline_mode<synchronous>, transform_indices = @transform_5, window_bounds = array<i64: 1, 32>}, {pipeline_mode = #tpu.pipeline_mode<synchronous>, transform_indices = @transform_6, window_bounds = array<i64: 1, 32>}, {transform_indices = @transform_7, window_bounds = array<i64: 16, 32>}]} {
    %c0 = arith.constant 0 : index
    %c0_0 = arith.constant 0 : index
    %0 = vector.load %arg1[%c0, %c0_0] : memref<16x32xf32, #tpu.memory_space<vmem>>, vector<16x32xf32>
    %1 = arith.truncf %0 : vector<16x32xf32> to vector<16x32xbf16>
    %c0_1 = arith.constant 0 : index
    %c0_2 = arith.constant 0 : index
    %2 = vector.load %arg2[%c0_1, %c0_2] : memref<32x64xbf16, #tpu.memory_space<vmem>>, vector<32x64xbf16>
    %cst = arith.constant dense<0.000000e+00> : vector<16x64xf32>
    %3 = tpu.matmul %1, %2, %cst {dimension_numbers = #tpu.dot_dimension_numbers<[1], [0], [0], [1], [0, 0, 1, 1], [], []>} : vector<16x32xbf16>, vector<32x64xbf16>, vector<16x64xf32> -> vector<16x64xf32>
    %c0_3 = arith.constant 0 : index
    %c0_4 = arith.constant 0 : index
    %4 = vector.load %arg3[%c0_3, %c0_4] : memref<1x64xf32, #tpu.memory_space<vmem>>, vector<1x64xf32>
    %5 = vector.broadcast %4 : vector<1x64xf32> to vector<16x64xf32>
    %6 = arith.addf %3, %5 : vector<16x64xf32>
    %cst_5 = arith.constant 0.000000e+00 : f32
    %7 = vector.broadcast %cst_5 : f32 to vector<16x64xf32>
    %8 = arith.maximumf %6, %7 : vector<16x64xf32>
    %9 = arith.truncf %8 : vector<16x64xf32> to vector<16x64xbf16>
    %c0_6 = arith.constant 0 : index
    %c0_7 = arith.constant 0 : index
    %10 = vector.load %arg4[%c0_6, %c0_7] : memref<64x32xbf16, #tpu.memory_space<vmem>>, vector<64x32xbf16>
    %cst_8 = arith.constant dense<0.000000e+00> : vector<16x32xf32>
    %11 = tpu.matmul %9, %10, %cst_8 {dimension_numbers = #tpu.dot_dimension_numbers<[1], [0], [0], [1], [0, 0, 1, 1], [], []>} : vector<16x64xbf16>, vector<64x32xbf16>, vector<16x32xf32> -> vector<16x32xf32>
    %c0_9 = arith.constant 0 : index
    %c0_10 = arith.constant 0 : index
    %12 = vector.load %arg5[%c0_9, %c0_10] : memref<1x32xf32, #tpu.memory_space<vmem>>, vector<1x32xf32>
    %13 = vector.broadcast %12 : vector<1x32xf32> to vector<16x32xf32>
    %14 = arith.addf %11, %13 : vector<16x32xf32>
    %15 = arith.addf %0, %14 : vector<16x32xf32>
    %cst_11 = arith.constant dense<0.000000e+00> : vector<16xf32>
    %16 = vector.multi_reduction <add>, %15, %cst_11 [1] : vector<16x32xf32> to vector<16xf32>
    %17 = vector.shape_cast %16 : vector<16xf32> to vector<16x1xf32>
    %cst_12 = arith.constant 3.200000e+01 : f32
    %18 = vector.broadcast %cst_12 : f32 to vector<16x1xf32>
    %19 = arith.divf %17, %18 : vector<16x1xf32>
    %20 = vector.broadcast %19 : vector<16x1xf32> to vector<16x32xf32>
    %21 = arith.subf %15, %20 : vector<16x32xf32>
    %22 = arith.mulf %21, %21 : vector<16x32xf32>
    %cst_13 = arith.constant dense<0.000000e+00> : vector<16xf32>
    %23 = vector.multi_reduction <add>, %22, %cst_13 [1] : vector<16x32xf32> to vector<16xf32>
    %24 = vector.shape_cast %23 : vector<16xf32> to vector<16x1xf32>
    %cst_14 = arith.constant 3.200000e+01 : f32
    %25 = vector.broadcast %cst_14 : f32 to vector<16x1xf32>
    %26 = arith.divf %24, %25 : vector<16x1xf32>
    %27 = vector.broadcast %19 : vector<16x1xf32> to vector<16x32xf32>
    %28 = arith.subf %15, %27 : vector<16x32xf32>
    %cst_15 = arith.constant 9.99999974E-6 : f32
    %29 = vector.broadcast %cst_15 : f32 to vector<16x1xf32>
    %30 = arith.addf %26, %29 : vector<16x1xf32>
    %31 = math.rsqrt %30 : vector<16x1xf32>
    %32 = vector.broadcast %31 : vector<16x1xf32> to vector<16x32xf32>
    %33 = arith.mulf %28, %32 : vector<16x32xf32>
    %c0_16 = arith.constant 0 : index
    %c0_17 = arith.constant 0 : index
    %34 = vector.load %arg6[%c0_16, %c0_17] : memref<1x32xf32, #tpu.memory_space<vmem>>, vector<1x32xf32>
    %35 = vector.broadcast %34 : vector<1x32xf32> to vector<16x32xf32>
    %36 = arith.mulf %33, %35 : vector<16x32xf32>
    %c0_18 = arith.constant 0 : index
    %c0_19 = arith.constant 0 : index
    %37 = vector.load %arg7[%c0_18, %c0_19] : memref<1x32xf32, #tpu.memory_space<vmem>>, vector<1x32xf32>
    %38 = vector.broadcast %37 : vector<1x32xf32> to vector<16x32xf32>
    %39 = arith.addf %36, %38 : vector<16x32xf32>
    %c0_20 = arith.constant 0 : index
    %c0_21 = arith.constant 0 : index
    %40 = vector.load %arg8[%c0_20, %c0_21] : memref<16x32xf32, #tpu.memory_space<vmem>>, vector<16x32xf32>
    tpu.vector_store %arg8[%c0_20, %c0_21], %39 {strides = array<i32>} : memref<16x32xf32, #tpu.memory_space<vmem>>, vector<16x32xf32>,
    return
  }
  func.func @transform_0(%arg0: i32) -> (i32, i32) {
    %c0_i32 = arith.constant 0 : i32
    %c0_i32_0 = arith.constant 0 : i32
    return %arg0, %c0_i32 : i32, i32
  }
  func.func @transform_1(%arg0: i32) -> (i32, i32) {
    %c0_i32 = arith.constant 0 : i32
    %c0_i32_0 = arith.constant 0 : i32
    %c0_i32_1 = arith.constant 0 : i32
    return %c0_i32, %c0_i32_0 : i32, i32
  }
  func.func @transform_2(%arg0: i32) -> (i32, i32) {
    %c0_i32 = arith.constant 0 : i32
    %c0_i32_0 = arith.constant 0 : i32
    %c0_i32_1 = arith.constant 0 : i32
    return %c0_i32, %c0_i32_0 : i32, i32
  }
  func.func @transform_3(%arg0: i32) -> (i32, i32) {
    %c0_i32 = arith.constant 0 : i32
    %c0_i32_0 = arith.constant 0 : i32
    %c0_i32_1 = arith.constant 0 : i32
    return %c0_i32, %c0_i32_0 : i32, i32
  }
  func.func @transform_4(%arg0: i32) -> (i32, i32) {
    %c0_i32 = arith.constant 0 : i32
    %c0_i32_0 = arith.constant 0 : i32
    %c0_i32_1 = arith.constant 0 : i32
    return %c0_i32, %c0_i32_0 : i32, i32
  }
  func.func @transform_5(%arg0: i32) -> (i32, i32) {
    %c0_i32 = arith.constant 0 : i32
    %c0_i32_0 = arith.constant 0 : i32
    %c0_i32_1 = arith.constant 0 : i32
    return %c0_i32, %c0_i32_0 : i32, i32
  }
  func.func @transform_6(%arg0: i32) -> (i32, i32) {
    %c0_i32 = arith.constant 0 : i32
    %c0_i32_0 = arith.constant 0 : i32
    %c0_i32_1 = arith.constant 0 : i32
    return %c0_i32, %c0_i32_0 : i32, i32
  }
  func.func @transform_7(%arg0: i32) -> (i32, i32) {
    %c0_i32 = arith.constant 0 : i32
    %c0_i32_0 = arith.constant 0 : i32
    return %arg0, %c0_i32 : i32, i32
  }
}

module attributes {stable_mosaic.version = 11 : i64} {
  func.func @kernel(%arg0: i32, %arg1: memref<16x32xf32, #tpu.memory_space<vmem>>, %arg2: memref<32x32xbf16, #tpu.memory_space<vmem>>, %arg3: memref<32x32xbf16, #tpu.memory_space<vmem>>, %arg4: memref<1x32xf32, #tpu.memory_space<vmem>>, %arg5: memref<1x32xf32, #tpu.memory_space<vmem>>, %arg6: memref<16x32xbf16, #tpu.memory_space<vmem>>, %arg7: memref<16x32xbf16, #tpu.memory_space<vmem>>) attributes {dimension_semantics = [#tpu.dimension_semantics<parallel>], iteration_bounds = array<i64: 1>, scalar_prefetch = 0 : i64, scratch_operands = 0 : i64, tpu.core_type = #tpu.core_type<tc>, window_params = [{transform_indices = @transform_0, window_bounds = array<i64: 16, 32>}, {pipeline_mode = #tpu.pipeline_mode<synchronous>, transform_indices = @transform_1, window_bounds = array<i64: 32, 32>}, {pipeline_mode = #tpu.pipeline_mode<synchronous>, transform_indices = @transform_2, window_bounds = array<i64: 32, 32>}, {pipeline_mode = #tpu.pipeline_mode<synchronous>, transform_indices = @transform_3, window_bounds = array<i64: 1, 32>}, {pipeline_mode = #tpu.pipeline_mode<synchronous>, transform_indices = @transform_4, window_bounds = array<i64: 1, 32>}, {transform_indices = @transform_5, window_bounds = array<i64: 16, 32>}, {transform_indices = @transform_6, window_bounds = array<i64: 16, 32>}]} {
    %c0 = arith.constant 0 : index
    %c0_0 = arith.constant 0 : index
    %0 = vector.load %arg1[%c0, %c0_0] : memref<16x32xf32, #tpu.memory_space<vmem>>, vector<16x32xf32>
    %1 = arith.truncf %0 : vector<16x32xf32> to vector<16x32xbf16>
    %c0_1 = arith.constant 0 : index
    %c0_2 = arith.constant 0 : index
    %2 = vector.load %arg2[%c0_1, %c0_2] : memref<32x32xbf16, #tpu.memory_space<vmem>>, vector<32x32xbf16>
    %cst = arith.constant dense<0.000000e+00> : vector<16x32xf32>
    %3 = tpu.matmul %1, %2, %cst {dimension_numbers = #tpu.dot_dimension_numbers<[1], [0], [0], [1], [0, 0, 1, 1], [], []>} : vector<16x32xbf16>, vector<32x32xbf16>, vector<16x32xf32> -> vector<16x32xf32>
    %c0_3 = arith.constant 0 : index
    %c0_4 = arith.constant 0 : index
    %4 = vector.load %arg4[%c0_3, %c0_4] : memref<1x32xf32, #tpu.memory_space<vmem>>, vector<1x32xf32>
    %5 = vector.broadcast %4 : vector<1x32xf32> to vector<16x32xf32>
    %6 = arith.addf %3, %5 : vector<16x32xf32>
    %7 = arith.truncf %6 : vector<16x32xf32> to vector<16x32xbf16>
    %c0_5 = arith.constant 0 : index
    %c0_6 = arith.constant 0 : index
    %8 = vector.load %arg6[%c0_5, %c0_6] : memref<16x32xbf16, #tpu.memory_space<vmem>>, vector<16x32xbf16>
    tpu.vector_store %arg6[%c0_5, %c0_6], %7 {strides = array<i32>} : memref<16x32xbf16, #tpu.memory_space<vmem>>, vector<16x32xbf16>,
    %c0_7 = arith.constant 0 : index
    %c0_8 = arith.constant 0 : index
    %9 = vector.load %arg3[%c0_7, %c0_8] : memref<32x32xbf16, #tpu.memory_space<vmem>>, vector<32x32xbf16>
    %cst_9 = arith.constant dense<0.000000e+00> : vector<16x32xf32>
    %10 = tpu.matmul %1, %9, %cst_9 {dimension_numbers = #tpu.dot_dimension_numbers<[1], [0], [0], [1], [0, 0, 1, 1], [], []>} : vector<16x32xbf16>, vector<32x32xbf16>, vector<16x32xf32> -> vector<16x32xf32>
    %c0_10 = arith.constant 0 : index
    %c0_11 = arith.constant 0 : index
    %11 = vector.load %arg5[%c0_10, %c0_11] : memref<1x32xf32, #tpu.memory_space<vmem>>, vector<1x32xf32>
    %12 = vector.broadcast %11 : vector<1x32xf32> to vector<16x32xf32>
    %13 = arith.addf %10, %12 : vector<16x32xf32>
    %14 = arith.truncf %13 : vector<16x32xf32> to vector<16x32xbf16>
    %c0_12 = arith.constant 0 : index
    %c0_13 = arith.constant 0 : index
    %15 = vector.load %arg7[%c0_12, %c0_13] : memref<16x32xbf16, #tpu.memory_space<vmem>>, vector<16x32xbf16>
    tpu.vector_store %arg7[%c0_12, %c0_13], %14 {strides = array<i32>} : memref<16x32xbf16, #tpu.memory_space<vmem>>, vector<16x32xbf16>,
    return
  }
  func.func @transform_0(%arg0: i32) -> (i32, i32) {
    %c0_i32 = arith.constant 0 : i32
    %c0_i32_0 = arith.constant 0 : i32
    return %arg0, %c0_i32 : i32, i32
  }
  func.func @transform_1(%arg0: i32) -> (i32, i32) {
    %c0_i32 = arith.constant 0 : i32
    %c0_i32_0 = arith.constant 0 : i32
    %c0_i32_1 = arith.constant 0 : i32
    return %c0_i32, %c0_i32_0 : i32, i32
  }
  func.func @transform_2(%arg0: i32) -> (i32, i32) {
    %c0_i32 = arith.constant 0 : i32
    %c0_i32_0 = arith.constant 0 : i32
    %c0_i32_1 = arith.constant 0 : i32
    return %c0_i32, %c0_i32_0 : i32, i32
  }
  func.func @transform_3(%arg0: i32) -> (i32, i32) {
    %c0_i32 = arith.constant 0 : i32
    %c0_i32_0 = arith.constant 0 : i32
    %c0_i32_1 = arith.constant 0 : i32
    return %c0_i32, %c0_i32_0 : i32, i32
  }
  func.func @transform_4(%arg0: i32) -> (i32, i32) {
    %c0_i32 = arith.constant 0 : i32
    %c0_i32_0 = arith.constant 0 : i32
    %c0_i32_1 = arith.constant 0 : i32
    return %c0_i32, %c0_i32_0 : i32, i32
  }
  func.func @transform_5(%arg0: i32) -> (i32, i32) {
    %c0_i32 = arith.constant 0 : i32
    %c0_i32_0 = arith.constant 0 : i32
    return %arg0, %c0_i32 : i32, i32
  }
  func.func @transform_6(%arg0: i32) -> (i32, i32) {
    %c0_i32 = arith.constant 0 : i32
    %c0_i32_0 = arith.constant 0 : i32
    return %arg0, %c0_i32 : i32, i32
  }
}

module attributes {stable_mosaic.version = 11 : i64} {
  func.func @_matmul_kernel(%arg0: i32, %arg1: i32, %arg2: i32, %arg3: memref<16x32xf32, #tpu.memory_space<vmem>>, %arg4: memref<32x16xbf16, #tpu.memory_space<vmem>>, %arg5: memref<1x16xf32, #tpu.memory_space<vmem>>, %arg6: memref<16x16xf32, #tpu.memory_space<vmem>>, %arg7: memref<16x16xf32, #tpu.memory_space<vmem>>) attributes {dimension_semantics = [#tpu.dimension_semantics<parallel>, #tpu.dimension_semantics<parallel>, #tpu.dimension_semantics<arbitrary>], iteration_bounds = array<i64: 1, 1, 1>, scalar_prefetch = 0 : i64, scratch_operands = 1 : i64, tpu.core_type = #tpu.core_type<tc>, window_params = [{transform_indices = @transform_0, window_bounds = array<i64: 16, 32>}, {transform_indices = @transform_1, window_bounds = array<i64: 32, 16>}, {transform_indices = @transform_2, window_bounds = array<i64: 1, 16>}, {transform_indices = @transform_3, window_bounds = array<i64: 16, 16>}]} {
    %c0_i32 = arith.constant 0 : i32
    %0 = arith.cmpi eq, %arg2, %c0_i32 : i32
    %1 = arith.extui %0 : i1 to i32
    %c0_i32_0 = arith.constant 0 : i32
    %2 = arith.cmpi ne, %1, %c0_i32_0 : i32
    scf.if %2 {
      %cst_10 = arith.constant 0.000000e+00 : f32
      %13 = vector.broadcast %cst_10 : f32 to vector<16x16xf32>
      %c0_11 = arith.constant 0 : index
      %c0_12 = arith.constant 0 : index
      %14 = vector.load %arg7[%c0_11, %c0_12] : memref<16x16xf32, #tpu.memory_space<vmem>>, vector<16x16xf32>
      tpu.vector_store %arg7[%c0_11, %c0_12], %13 {strides = array<i32>} : memref<16x16xf32, #tpu.memory_space<vmem>>, vector<16x16xf32>,
    } else {
    }
    %c0 = arith.constant 0 : index
    %c0_1 = arith.constant 0 : index
    %3 = vector.load %arg7[%c0, %c0_1] : memref<16x16xf32, #tpu.memory_space<vmem>>, vector<16x16xf32>
    %c0_2 = arith.constant 0 : index
    %c0_3 = arith.constant 0 : index
    %4 = vector.load %arg3[%c0_2, %c0_3] : memref<16x32xf32, #tpu.memory_space<vmem>>, vector<16x32xf32>
    %5 = arith.truncf %4 : vector<16x32xf32> to vector<16x32xbf16>
    %c0_4 = arith.constant 0 : index
    %c0_5 = arith.constant 0 : index
    %6 = vector.load %arg4[%c0_4, %c0_5] : memref<32x16xbf16, #tpu.memory_space<vmem>>, vector<32x16xbf16>
    %cst = arith.constant dense<0.000000e+00> : vector<16x16xf32>
    %7 = tpu.matmul %5, %6, %cst {dimension_numbers = #tpu.dot_dimension_numbers<[1], [0], [0], [1], [0, 0, 1, 1], [], []>} : vector<16x32xbf16>, vector<32x16xbf16>, vector<16x16xf32> -> vector<16x16xf32>
    %8 = arith.addf %3, %7 : vector<16x16xf32>
    %c0_6 = arith.constant 0 : index
    %c0_7 = arith.constant 0 : index
    %9 = vector.load %arg7[%c0_6, %c0_7] : memref<16x16xf32, #tpu.memory_space<vmem>>, vector<16x16xf32>
    tpu.vector_store %arg7[%c0_6, %c0_7], %8 {strides = array<i32>} : memref<16x16xf32, #tpu.memory_space<vmem>>, vector<16x16xf32>,
    %c0_i32_8 = arith.constant 0 : i32
    %10 = arith.cmpi eq, %arg2, %c0_i32_8 : i32
    %11 = arith.extui %10 : i1 to i32
    %c0_i32_9 = arith.constant 0 : i32
    %12 = arith.cmpi ne, %11, %c0_i32_9 : i32
    scf.if %12 {
      %c0_10 = arith.constant 0 : index
      %c0_11 = arith.constant 0 : index
      %13 = vector.load %arg7[%c0_10, %c0_11] : memref<16x16xf32, #tpu.memory_space<vmem>>, vector<16x16xf32>
      %c0_12 = arith.constant 0 : index
      %c0_13 = arith.constant 0 : index
      %14 = vector.load %arg5[%c0_12, %c0_13] : memref<1x16xf32, #tpu.memory_space<vmem>>, vector<1x16xf32>
      %15 = vector.broadcast %14 : vector<1x16xf32> to vector<16x16xf32>
      %16 = arith.addf %13, %15 : vector<16x16xf32>
      %c0_14 = arith.constant 0 : index
      %c0_15 = arith.constant 0 : index
      %17 = vector.load %arg6[%c0_14, %c0_15] : memref<16x16xf32, #tpu.memory_space<vmem>>, vector<16x16xf32>
      tpu.vector_store %arg6[%c0_14, %c0_15], %16 {strides = array<i32>} : memref<16x16xf32, #tpu.memory_space<vmem>>, vector<16x16xf32>,
    } else {
    }
    return
  }
  func.func @transform_0(%arg0: i32, %arg1: i32, %arg2: i32) -> (i32, i32) {
    %c0_i32 = arith.constant 0 : i32
    return %arg0, %arg2 : i32, i32
  }
  func.func @transform_1(%arg0: i32, %arg1: i32, %arg2: i32) -> (i32, i32) {
    %c0_i32 = arith.constant 0 : i32
    return %arg2, %arg1 : i32, i32
  }
  func.func @transform_2(%arg0: i32, %arg1: i32, %arg2: i32) -> (i32, i32) {
    %c0_i32 = arith.constant 0 : i32
    %c0_i32_0 = arith.constant 0 : i32
    return %c0_i32, %arg1 : i32, i32
  }
  func.func @transform_3(%arg0: i32, %arg1: i32, %arg2: i32) -> (i32, i32) {
    %c0_i32 = arith.constant 0 : i32
    return %arg0, %arg1 : i32, i32
  }
}

module attributes {stable_mosaic.version = 11 : i64} {
  func.func @kernel(%arg0: i32, %arg1: memref<16x32xf32, #tpu.memory_space<vmem>>, %arg2: memref<32x32xbf16, #tpu.memory_space<vmem>>, %arg3: memref<1x32xf32, #tpu.memory_space<vmem>>, %arg4: memref<16x32xbf16, #tpu.memory_space<vmem>>) attributes {dimension_semantics = [#tpu.dimension_semantics<parallel>], iteration_bounds = array<i64: 1>, scalar_prefetch = 0 : i64, scratch_operands = 0 : i64, tpu.core_type = #tpu.core_type<tc>, window_params = [{transform_indices = @transform_0, window_bounds = array<i64: 16, 32>}, {pipeline_mode = #tpu.pipeline_mode<synchronous>, transform_indices = @transform_1, window_bounds = array<i64: 32, 32>}, {pipeline_mode = #tpu.pipeline_mode<synchronous>, transform_indices = @transform_2, window_bounds = array<i64: 1, 32>}, {transform_indices = @transform_3, window_bounds = array<i64: 16, 32>}]} {
    %c0 = arith.constant 0 : index
    %c0_0 = arith.constant 0 : index
    %0 = vector.load %arg1[%c0, %c0_0] : memref<16x32xf32, #tpu.memory_space<vmem>>, vector<16x32xf32>
    %1 = arith.truncf %0 : vector<16x32xf32> to vector<16x32xbf16>
    %c0_1 = arith.constant 0 : index
    %c0_2 = arith.constant 0 : index
    %2 = vector.load %arg2[%c0_1, %c0_2] : memref<32x32xbf16, #tpu.memory_space<vmem>>, vector<32x32xbf16>
    %cst = arith.constant dense<0.000000e+00> : vector<16x32xf32>
    %3 = tpu.matmul %1, %2, %cst {dimension_numbers = #tpu.dot_dimension_numbers<[1], [0], [0], [1], [0, 0, 1, 1], [], []>} : vector<16x32xbf16>, vector<32x32xbf16>, vector<16x32xf32> -> vector<16x32xf32>
    %c0_3 = arith.constant 0 : index
    %c0_4 = arith.constant 0 : index
    %4 = vector.load %arg3[%c0_3, %c0_4] : memref<1x32xf32, #tpu.memory_space<vmem>>, vector<1x32xf32>
    %5 = vector.broadcast %4 : vector<1x32xf32> to vector<16x32xf32>
    %6 = arith.addf %3, %5 : vector<16x32xf32>
    %7 = arith.truncf %6 : vector<16x32xf32> to vector<16x32xbf16>
    %c0_5 = arith.constant 0 : index
    %c0_6 = arith.constant 0 : index
    %8 = vector.load %arg4[%c0_5, %c0_6] : memref<16x32xbf16, #tpu.memory_space<vmem>>, vector<16x32xbf16>
    tpu.vector_store %arg4[%c0_5, %c0_6], %7 {strides = array<i32>} : memref<16x32xbf16, #tpu.memory_space<vmem>>, vector<16x32xbf16>,
    return
  }
  func.func @transform_0(%arg0: i32) -> (i32, i32) {
    %c0_i32 = arith.constant 0 : i32
    %c0_i32_0 = arith.constant 0 : i32
    return %arg0, %c0_i32 : i32, i32
  }
  func.func @transform_1(%arg0: i32) -> (i32, i32) {
    %c0_i32 = arith.constant 0 : i32
    %c0_i32_0 = arith.constant 0 : i32
    %c0_i32_1 = arith.constant 0 : i32
    return %c0_i32, %c0_i32_0 : i32, i32
  }
  func.func @transform_2(%arg0: i32) -> (i32, i32) {
    %c0_i32 = arith.constant 0 : i32
    %c0_i32_0 = arith.constant 0 : i32
    %c0_i32_1 = arith.constant 0 : i32
    return %c0_i32, %c0_i32_0 : i32, i32
  }
  func.func @transform_3(%arg0: i32) -> (i32, i32) {
    %c0_i32 = arith.constant 0 : i32
    %c0_i32_0 = arith.constant 0 : i32
    return %arg0, %c0_i32 : i32, i32
  }
}

</mosaic_0001>

<bundles_post_ra>
// kernel: transformer_forward.27
= control target key start
LH: loop header
LB: loop body
LE: loop exit
PB: predicated region body
PF: predicated region fallthrough
CT: control target
= control target key end

     0   :  { %v181_v0 = vmov 0.0   ;;  %vm182_vm0 = vmmov 0   ;;  %vm54_vm1 = vcmask 261120   ;;  %s255_s1 = inlined_call_operand.vmem [shape: bf16[32,32], index: 1, kind: input, shape index: {}]   ;;  %s256_s0 = inlined_call_operand.vmem [shape: bf16[16,32], index: 0, kind: input, shape index: {}]   ;;  %s257_s2 = inlined_call_operand.vmem [shape: f32[1,32], index: 2, kind: input, shape index: {}]   ;;  %s258_s3 = inlined_call_operand.vmem [shape: f32[16,32], index: 3, kind: input, shape index: {}]   ;;  %s259_s4 = inlined_call_operand.vmem [shape: f32[1,32], index: 4, kind: input, shape index: {}]   ;;  %s260_s5 = inlined_call_operand.vmem [shape: f32[1,32], index: 5, kind: input, shape index: {}]   ;;  %s261_s6 = inlined_call_operand.vmem [shape: f32[16,32], index: 6, kind: output, shape index: {}]  }
   0x1   :  { %164 = vmatprep.subr.bf16.mxu0 %v181_v0  ;;  %v174_v1 = vld [vmem:[%s255_s1] sm:$0xff]   ;;  %168 = vmatprep.mubr.msk.bf16.mxu0 %vm182_vm0, %v181_v0  ;;  %v175_v2 = vld [vmem:[%s255_s1 + $0x8] sm:$0xff]  }
   0x2   :  { %165 = vmatpush3.bf16.msra.mxu0 %v174_v1  ;;  %v176_v3 = vld [vmem:[%s256_s0] sm:$0xff]   ;;  %v100_v10 = vld [vmem:[%s258_s3 + $0x8] sm:$0xff] }
   0x3   :  { %166 = vmatprep.subr.bf16.mxu0 %v181_v0  ;;  %v154_v4 = vld [vmem:[%s257_s2] ss:$0 sm:$0xff] }
   0x4   :  { %v99_v6 = vld [vmem:[%s258_s3] sm:$0xff] }
   0x5   :  { %v159_v34 = vld [vmem:[%s259_s4] ss:$0 sm:$0xff] }
   0x6   :  { %167 = vmatpush3.bf16.msra.mxu0 %v175_v2  ;;  %v160_v36 = vld [vmem:[%s260_s5] ss:$0 sm:$0xff] }
   0x9   :  { %169 = vmatmul.mubr.msk.bf16.vlgmr.msra.gmra.mrb[0].mxu0 %vm54_vm1, %v176_v3 }
  0xdc   :  { %v92_v5 = vpop.f32.mrb[0].mxu0 }
  0xdd   :  { %v93_v7 = vadd.f32 %v154_v4, %v92_v5  ;;  %v170_v8 = vpop.f32.mrb[1].mxu0 }
  0xde   :  { %v95_v9 = vpop.f32.mrb[2].mxu0 }
  0xdf   :  { %v96_v11 = vadd.f32 %v154_v4, %v95_v9  ;;  %v171_v12 = vpop.f32.mrb[3].mxu0  ;;  %v101_v13 = vadd.f32 %v99_v6, %v93_v7 }
  0xe1   :  { %v103_v14 = vsel %vm54_vm1, %v101_v13, 0.0  ;;  %v102_v15 = vadd.f32 %v100_v10, %v96_v11 }
  0xe2   :  { %104 = vadd.xlane.f32.xlu0 %v103_v14 }
  0xe3   :  { %v106_v16 = vsel %vm54_vm1, %v102_v15, 0.0 }
  0xe6   :  { %107 = vadd.xlane.f32.xlu0 %v106_v16 }
 0x16f   :  { %v105_v17 = vpop.xlane.xlu0 %104 }
 0x170   :  { %v110_v18 = vmul.f32 0.03125, %v105_v17 }
 0x172   :  { %v112_v19 = vsub.f32 %v101_v13, %v110_v18 }
 0x173   :  { %v108_v20 = vpop.xlane.xlu0 %107 }
 0x174   :  { %v111_v21 = vmul.f32 0.03125, %v108_v20  ;;  %v114_v22 = vmul.f32 %v112_v19, %v112_v19 }
 0x176   :  { %v113_v23 = vsub.f32 %v102_v15, %v111_v21  ;;  %v116_v24 = vsel %vm54_vm1, %v114_v22, 0.0 }
 0x177   :  { %117 = vadd.xlane.f32.xlu1 %v116_v24 }
 0x178   :  { %v115_v25 = vmul.f32 %v113_v23, %v113_v23 }
 0x17a   :  { %v119_v26 = vsel %vm54_vm1, %v115_v25, 0.0 }
 0x17b   :  { %120 = vadd.xlane.f32.xlu1 %v119_v26 }
 0x204   :  { %v118_v27 = vpop.xlane.xlu1 %117 }
 0x205   :  { %v122_v28 = vmul.f32 0.03125, %v118_v27 }
 0x207   :  { %v124_v29 = vadd.f32 1e-05, %v122_v28 }
 0x208   :  { %v121_v30 = vpop.xlane.xlu1 %120 }
 0x209   :  { %177 = vrsqrt.f32 %v124_v29  ;;  %v123_v31 = vmul.f32 0.03125, %v121_v30 }
 0x20b   :  { %v125_v32 = vadd.f32 1e-05, %v123_v31 }
 0x20d   :  { %179 = vrsqrt.f32 %v125_v32 }
 0x213   :  { %v178_v33 = vpop.eup %177 }
 0x214   :  { %v128_v35 = vmul.f32 %v178_v33, %v112_v19 }
 0x216   :  { %v137_v37 = vmul.f32 %v159_v34, %v128_v35 }
 0x217   :  { %v180_v38 = vpop.eup %179 }
 0x218   :  { %v146_v39 = vadd.f32 %v160_v36, %v137_v37  ;;  %v129_v40 = vmul.f32 %v180_v38, %v113_v23 }
 0x21a   :  { %148 = vst.msk [vmem:[%s261_s6] sm:$0xff] %vm54_vm1, %v146_v39  ;;  %v138_v41 = vmul.f32 %v159_v34, %v129_v40 }
 0x21c   :  { %v147_v42 = vadd.f32 %v160_v36, %v138_v41 }
 0x21e   :  { %149 = vst.msk [vmem:[%s261_s6 + $0x8] sm:$0xff] %vm54_vm1, %v147_v42 }

// kernel: transformer_forward.25
= control target key start
LH: loop header
LB: loop body
LE: loop exit
PB: predicated region body
PF: predicated region fallthrough
CT: control target
= control target key end

     0   :  { %v337_v0 = vmov 0.0   ;;  %vm338_vm0 = vmmov 0   ;;  %vm56_vm1 = vcmask 261120   ;;  %vm109_vm2 = vcmask 257024   ;;  %s449_s1 = inlined_call_operand.vmem [shape: bf16[32,32], index: 1, kind: input, shape index: {}]   ;;  %s450_s2 = inlined_call_operand.vmem [shape: bf16[32,32], index: 2, kind: input, shape index: {}]   ;;  %s451_s0 = inlined_call_operand.vmem [shape: f32[16,32], index: 0, kind: input, shape index: {}]   ;;  %s452_s3 = inlined_call_operand.vmem [shape: bf16[32,32], index: 3, kind: input, shape index: {}]   ;;  %s453_s4 = inlined_call_operand.vmem [shape: f32[1,32], index: 4, kind: input, shape index: {}]   ;;  %s454_s5 = inlined_call_operand.vmem [shape: f32[1,32], index: 5, kind: input, shape index: {}]   ;;  %s455_s7 = inlined_call_operand.vmem [shape: bf16[16,32], index: 7, kind: output, shape index: {0}]   ;;  %s456_s6 = inlined_call_operand.vmem [shape: f32[1,32], index: 6, kind: input, shape index: {}]   ;;  %s457_s8 = inlined_call_operand.vmem [shape: bf16[16,32], index: 8, kind: output, shape index: {1}]   ;;  %s458_s9 = inlined_call_operand.vmem [shape: bf16[16,32], index: 9, kind: output, shape index: {2}]  }
   0x1   :  { %305 = vmatprep.subr.bf16.mxu0 %v337_v0  ;;  %v331_v1 = vld [vmem:[%s449_s1] sm:$0xff]   ;;  %313 = vmatprep.subr.bf16.mxu1 %v337_v0  ;;  %v332_v2 = vld [vmem:[%s449_s1 + $0x8] sm:$0xff]  }
   0x2   :  { %309 = vmatprep.mubr.msk.bf16.mxu0 %vm338_vm0, %v337_v0  ;;  %317 = vmatprep.mubr.msk.bf16.mxu1 %vm338_vm0, %v337_v0  ;;  %v333_v3 = vld [vmem:[%s450_s2] sm:$0xff]   ;;  %v31_v5 = vld [vmem:[%s451_s0 + $0x8] sm:$0xff] }
   0x3   :  { %306 = vmatpush3.bf16.msra.mxu0 %v331_v1  ;;  %v30_v4 = vld [vmem:[%s451_s0] sm:$0xff]  ;;  %314 = vmatpush3.bf16.msra.mxu1 %v333_v3  ;;  %v335_v7 = vld [vmem:[%s450_s2 + $0x8] sm:$0xff]  }
   0x4   :  { %307 = vmatprep.subr.bf16.mxu0 %v337_v0  ;;  %v32_v6 = vpack.c.bf16 %v31_v5, %v30_v4  ;;  %315 = vmatprep.subr.bf16.mxu1 %v337_v0  ;;  %v334_v8 = vld [vmem:[%s452_s3] sm:$0xff]   ;;  %v336_v9 = vld [vmem:[%s452_s3 + $0x8] sm:$0xff]  }
   0x5   :  { %v272_v10 = vld [vmem:[%s453_s4] ss:$0 sm:$0xff] }
   0x6   :  { %v278_v12 = vld [vmem:[%s454_s5] ss:$0 sm:$0xff] }
   0x7   :  { %308 = vmatpush3.bf16.msra.mxu0 %v332_v2  ;;  %316 = vmatpush3.bf16.msra.mxu1 %v335_v7  ;;  %v284_v27 = vld [vmem:[%s456_s6] ss:$0 sm:$0xff] }
   0x8   :  { %321 = vmatprep.subr.bf16.mxu0 %v337_v0 }
   0xa   :  { %310 = vmatmul.mubr.msk.bf16.vlgmr.msra.gmra.mrb[0].mxu0 %vm56_vm1, %v32_v6  ;;  %318 = vmatmul.mubr.msk.bf16.vlgmr.msra.gmra.mrb[0].mxu1 %vm56_vm1, %v32_v6 }
   0xb   :  { %322 = vmatpush3.bf16.msra.mxu0 %v334_v8  ;;  %325 = vmatprep.mubr.msk.bf16.mxu0 %vm338_vm0, %v337_v0 }
   0xc   :  { %323 = vmatprep.subr.bf16.mxu0 %v337_v0 }
   0xf   :  { %324 = vmatpush3.bf16.msra.mxu0 %v336_v9 }
  0x12   :  { %326 = vmatmul.mubr.msk.bf16.vlgmr.msra.gmra.mrb[4].mxu0 %vm56_vm1, %v32_v6 }
  0xdd   :  { %v94_v11 = vpop.f32.mrb[0].mxu0  ;;  %v169_v16 = vpop.f32.mrb[0].mxu1 }
  0xde   :  { %v95_v13 = vadd.f32 %v272_v10, %v94_v11  ;;  %v311_v14 = vpop.f32.mrb[1].mxu0  ;;  %v170_v20 = vadd.f32 %v278_v12, %v169_v16  ;;  %v319_v21 = vpop.f32.mrb[1].mxu1 }
  0xdf   :  { %v97_v15 = vpop.f32.mrb[2].mxu0  ;;  %v172_v22 = vpop.f32.mrb[2].mxu1 }
  0xe0   :  { %v290_v17 = vpack.c.bf16 %v95_v13, %v95_v13  ;;  %v98_v18 = vadd.f32 %v272_v10, %v97_v15  ;;  %v312_v19 = vpop.f32.mrb[3].mxu0  ;;  %v292_v24 = vpack.c.bf16 %v170_v20, %v170_v20  ;;  %v173_v25 = vadd.f32 %v278_v12, %v172_v22  ;;  %v320_v26 = vpop.f32.mrb[3].mxu1 }
  0xe2   :  { %110 = vst.msk [vmem:[%s455_s7] sm:$0xf] %vm109_vm2, %v290_v17  ;;  %v291_v23 = vpack.c.bf16 %v98_v18, %v98_v18  ;;  %184 = vst.msk [vmem:[%s457_s8] sm:$0xf] %vm109_vm2, %v292_v24  ;;  %v293_v28 = vpack.c.bf16 %v173_v25, %v173_v25 }
  0xe4   :  { %111 = vst.msk [vmem:[%s455_s7 + $0x4] sm:$0xf] %vm109_vm2, %v291_v23  ;;  %185 = vst.msk [vmem:[%s457_s8 + $0x4] sm:$0xf] %vm109_vm2, %v293_v28 }
  0xe5   :  { %v243_v29 = vpop.f32.mrb[4].mxu0 }
  0xe6   :  { %v244_v30 = vadd.f32 %v284_v27, %v243_v29  ;;  %v327_v31 = vpop.f32.mrb[5].mxu0 }
  0xe7   :  { %v246_v32 = vpop.f32.mrb[6].mxu0 }
  0xe8   :  { %v294_v33 = vpack.c.bf16 %v244_v30, %v244_v30  ;;  %v247_v34 = vadd.f32 %v284_v27, %v246_v32  ;;  %v328_v35 = vpop.f32.mrb[7].mxu0 }
  0xea   :  { %258 = vst.msk [vmem:[%s458_s9] sm:$0xf] %vm109_vm2, %v294_v33  ;;  %v295_v36 = vpack.c.bf16 %v247_v34, %v247_v34 }
  0xec   :  { %259 = vst.msk [vmem:[%s458_s9 + $0x4] sm:$0xf] %vm109_vm2, %v295_v36 }

// kernel: transformer_forward.26
= control target key start
LH: loop header
LB: loop body
LE: loop exit
PB: predicated region body
PF: predicated region fallthrough
CT: control target
= control target key end

     0   :  { %s1072_s15 = smov 0   ;;  %s1074_s16 = smov 0   ;;  %s1192_s0 = inlined_call_operand.vmem [shape: bf16[2,8,32], index: 0, kind: input, shape index: {}]   ;;  %s1193_s1 = inlined_call_operand.vmem [shape: bf16[2,8,32], index: 1, kind: input, shape index: {}]   ;;  %s1194_s2 = inlined_call_operand.vmem [shape: bf16[2,8,32], index: 2, kind: input, shape index: {}]   ;;  %s1195_s3 = inlined_call_operand.vmem [shape: f32[2,8,8], index: 3, kind: input, shape index: {}]   ;;  %s1196_s4 = inlined_call_operand.vmem [shape: bf16[2,8,32], index: 4, kind: output, shape index: {}]  }
   0x1   :  { %s1076_s17 = smov 0  }
   0x2 LB: > { %s26_s18 = sadd.s32 1, %s1033_s16  ;;  %p881_p0 = scmp.ge.s32.totalorder %s1037_s17, 1  ;;  %s1037_s17 = sphi %s1076_s17, %s14_s17   ;;  %s1033_s16 = sphi %s1074_s16, %s1198_s16   ;;  %s1029_s15 = sphi %s1072_s15, %s1197_s15  }
   0x3   : > { %p28_p1 = scmp.ge.s32.totalorder %s26_s18, 2  ;;  %p212_p2 = scmp.lt.s32.totalorder %s1037_s17, 3 }
   0x5   : > { %s1200_s18 = smov (%p28_p1, %s26_s18), 0  ;;  %p213_p3 = pnand %p881_p0, %p212_p2 }
   0x6   : > { %p257_p4 = scmp.lt.s32.totalorder (!%p213_p3), %s1029_s15, 1  ;;  %v1039_v0 = vmov (!%p213_p3), 0.0   ;;  %vm1040_vm0 = vmmov (!%p213_p3), 0   ;;  %vm291_vm1 = vcmask (!%p213_p3), 64512   ;;  %s1041_s30 = smov (!%p213_p3), 120   ;;  %vm355_vm2 = vcmask (!%p213_p3), 1043456  }
   0x7   : > { %216 = sbr.rel (%p213_p3) target bundleno = 1482 (0x5ca), region = 36  ;;  %916 = vmatprep.subr.bf16.mxu0 (!%p213_p3), %v1039_v0  ;;  %918 = vmatprep.mubr.msk.bf16.mxu0 (!%p213_p3), %vm1040_vm0, %v1039_v0  ;;  %s1042_s5 = smov (!%p213_p3), 112   ;;  %vm757_vm3 = vcmask (!%p213_p3), 130048   ;;  %vm759_vm4 = vcmask (!%p213_p3), 195584   ;;  %vm762_vm5 = vcmask (!%p213_p3), 257024  }
   0x8   : > { %922 = vmatprep.subr.bf16.mxu1 (!%p213_p3), %v1039_v0  ;;  %924 = vmatprep.mubr.msk.bf16.mxu1 (!%p213_p3), %vm1040_vm0, %v1039_v0  ;;  %s1043_s6 = smov (!%p213_p3), 104   ;;  %s1044_s10 = smov (!%p213_p3), 8  }
   0x9   : > { %s1045_s11 = smov (!%p213_p3), 16   ;;  %s1046_s12 = smov (!%p213_p3), 24  }
   0xe   : > { %s1202_s15 = smov (!%p257_p4, %s1029_s15), 1 }
   0xf   : > { %s1096_s19 = sshll.u32 %s1202_s15, 2  ;;  %s885_s26 = sshll.u32 %s1202_s15, 3 }
  0x10   : > { %s267_s22 = scalar_lea.vmem %s1193_s1, %s1096_s19  ;;  %s263_s25 = scalar_lea.vmem %s1192_s0, %s1096_s19 }
  0x11   : > { %v288_v1 = vld [vmem:[%s267_s22] sm:$0xf]  ;;  %s278_s29 = scalar_lea.vmem %s1195_s3, %s885_s26  ;;  %s271_s9 = scalar_lea.vmem %s1194_s2, %s1096_s19 }
  0x12   : > { %v296_v2 = vsel %vm291_vm1, %v288_v1, 0  ;;  %v287_v3 = vld [vmem:[%s263_s25] sm:$0xf]  ;;  %v890_v12 = vcombine.low %v288_v1, %v288_v1  ;;  %s285_s15 = scalar_lea.vmem %s1196_s4, %s1096_s19 }
  0x13   : > { %917 = vmatpush3.bf16.xpose.msra.mxu0 %v296_v2  ;;  %v1114_v5 = vld [vmem:[%s278_s29] sm:$0xff]  ;;  %v889_v13 = vcombine.low %v287_v3, %v287_v3 }
  0x14   : > { %934 = vmatprep.subr.bf16.mxu0 %v1039_v0  ;;  %407 = vrot.lane.b32.xlu1 %v890_v12, %s1041_s30  ;;  %v1128_v19 = vld [vmem:[%s271_s9] sm:$0xf] }
  0x15   : > { %v357_v20 = vsel %vm355_vm2, %v1128_v19, 0 }
  0x16   : > { %923 = vmatpush3.bf16.msra.mxu1 %v357_v20 }
  0x17   : > { %928 = vmatprep.subr.bf16.mxu1 %v1039_v0 }
  0x18   : > { %402 = vrot.lane.b32.xlu1 %v889_v13, %s1041_s30 }
  0x1a   : > { %919 = vmatmul.mubr.msk.bf16.vlgmr.msra.gmra.mrb[0].mxu0 %vm291_vm1, %v287_v3 }
  0x1b   : > { %936 = vmatprep.mubr.msk.bf16.mxu0 %vm1040_vm0, %v1039_v0 }
  0x1c   : > { %520 = vrot.lane.b32.xlu1 %v889_v13, %s1042_s5 }
  0x20   : > { %634 = vrot.lane.b32.xlu1 %v890_v12, %s1043_s6 }
  0x24   : > { %632 = vrot.lane.b32.xlu1 %v889_v13, %s1043_s6 }
  0x86   : > { %v408_v23 = vpop.permute.xlu1 %407 }
  0x87   : > { %v413_v25 = vsel %vm291_vm1, %v408_v23, 0 }
  0x8a   : > { %v403_v27 = vpop.permute.xlu1 %402 }
  0x8e   : > { %v521_v29 = vpop.permute.xlu1 %520 }
  0x92   : > { %v635_v31 = vpop.permute.xlu1 %634 }
  0x93   : > { %v640_v32 = vsel %vm291_vm1, %v635_v31, 0 }
  0x96   : > { %v633_v33 = vpop.permute.xlu1 %632 }
  0xed   : > { %v332_v4 = vpop.f32.mrb[0].mxu0 }
  0xee   : > { %v338_v6 = vmul.f32 0.35355338, %v332_v4  ;;  %v920_v7 = vpop.f32.mrb[1].mxu0 }
  0xef   : > { %v335_v8 = vpop.f32.mrb[2].mxu0 }
  0xf0   : > { %v921_v9 = vpop.f32.mrb[3].mxu0  ;;  %v339_v10 = vadd.f32 %v338_v6, %v1114_v5 }
  0xf2   : > { %v340_v11 = vsel %vm291_vm1, %v339_v10, -inf }
  0xf3   : > { %341 = vmax.xlane.f32.xlu0 %v340_v11 }
 0x180   : > { %v342_v14 = vpop.xlane.xlu0 %341 }
 0x181   : > { %v343_v15 = vsub.f32 %v339_v10, %v342_v14 }
 0x183   : > { %v344_v16 = vmul.f32 1.442695, %v343_v15 }
 0x185   : > { %999 = vpow2.f32 %v344_v16 }
 0x18f   : > { %v1000_v17 = vpop.eup %999 }
 0x190   : > { %v346_v18 = vsel %vm291_vm1, %v1000_v17, 0.0 }
 0x191   : > { %347 = vadd.xlane.f32.xlu0 %v346_v18 }
 0x1a7   : > { %522 = vrot.lane.b32.xlu0 %v890_v12, %s1042_s5 }
 0x21e   : > { %v348_v21 = vpop.xlane.xlu0 %347 }
 0x21f   : > { %1001 = vrcp.f32 %v348_v21 }
 0x222   : > { %v523_v28 = vpop.permute.xlu0 %522 }
 0x223   : > { %v528_v30 = vsel %vm291_vm1, %v523_v28, 0 }
 0x229   : > { %v1002_v22 = vpop.eup %1001 }
 0x22a   : > { %v350_v24 = vmul.f32 %v1002_v22, %v1000_v17 }
 0x22c   : > { %v351_v26 = vpack.c.bf16 %v350_v24, %v350_v24 }
 0x22e   : > { %925 = vmatmul.mubr.msk.bf16.vlgmr.msra.gmra.mrb[0].mxu1 %vm291_vm1, %v351_v26 }
 0x22f   : > { %929 = vmatpush3.bf16.xpose.msra.mxu1 %v413_v25  ;;  %930 = vmatprep.mubr.msk.bf16.mxu1 %vm1040_vm0, %v1039_v0 }
 0x230   : > { %940 = vmatprep.subr.bf16.mxu1 %v1039_v0 }
 0x236   : > { %931 = vmatmul.mubr.msk.bf16.vlgmr.msra.gmra.mrb[4].mxu1 %vm291_vm1, %v403_v27 }
 0x237   : > { %941 = vmatpush3.bf16.xpose.msra.mxu1 %v528_v30  ;;  %942 = vmatprep.mubr.msk.bf16.mxu1 %vm1040_vm0, %v1039_v0 }
 0x238   : > { %952 = vmatprep.subr.bf16.mxu1 %v1039_v0 }
 0x23e   : > { %943 = vmatmul.mubr.msk.bf16.vlgmr.msra.gmra.mrb[8].mxu1 %vm291_vm1, %v521_v29 }
 0x23f   : > { %953 = vmatpush3.bf16.xpose.msra.mxu1 %v640_v32  ;;  %954 = vmatprep.mubr.msk.bf16.mxu1 %vm1040_vm0, %v1039_v0 }
 0x246   : > { %955 = vmatmul.mubr.msk.bf16.vlgmr.msra.gmra.mrb[12].mxu1 %vm291_vm1, %v633_v33 }
 0x301   : > { %v1149_v34 = vpop.f32.mrb[0].mxu1 }
 0x302   : > { %v926_v35 = vpop.f32.mrb[1].mxu1 }
 0x303   : > { %v396_v36 = vpop.f32.mrb[2].mxu1 }
 0x304   : > { %v927_v37 = vpop.f32.mrb[3].mxu1 }
 0x309   : > { %v449_v38 = vpop.f32.mrb[4].mxu1 }
 0x30a   : > { %v455_v39 = vmul.f32 0.35355338, %v449_v38  ;;  %v932_v40 = vpop.f32.mrb[5].mxu1 }
 0x30b   : > { %v452_v41 = vpop.f32.mrb[6].mxu1 }
 0x30c   : > { %v933_v42 = vpop.f32.mrb[7].mxu1  ;;  %v456_v43 = vadd.f32 %v455_v39, %v1114_v5 }
 0x30e   : > { %v457_v44 = vsel %vm291_vm1, %v456_v43, -inf }
 0x30f   : > { %458 = vmax.xlane.f32.xlu1 %v457_v44 }
 0x311   : > { %v564_v45 = vpop.f32.mrb[8].mxu1 }
 0x312   : > { %v570_v46 = vmul.f32 0.35355338, %v564_v45  ;;  %v944_v47 = vpop.f32.mrb[9].mxu1 }
 0x313   : > { %v567_v48 = vpop.f32.mrb[10].mxu1 }
 0x314   : > { %v571_v49 = vadd.f32 %v570_v46, %v1114_v5  ;;  %v945_v50 = vpop.f32.mrb[11].mxu1 }
 0x316   : > { %v572_v51 = vsel %vm291_vm1, %v571_v49, -inf }
 0x317   : > { %573 = vmax.xlane.f32.xlu0 %v572_v51 }
 0x319   : > { %v676_v52 = vpop.f32.mrb[12].mxu1 }
 0x31a   : > { %v682_v53 = vmul.f32 0.35355338, %v676_v52  ;;  %v956_v54 = vpop.f32.mrb[13].mxu1 }
 0x31b   : > { %v679_v55 = vpop.f32.mrb[14].mxu1 }
 0x31c   : > { %v683_v56 = vadd.f32 %v682_v53, %v1114_v5  ;;  %v957_v57 = vpop.f32.mrb[15].mxu1  ;;  %v892_v5 = vcombine.low %v1128_v19, %v1128_v19 }
 0x31e   : > { %v684_v58 = vsel %vm291_vm1, %v683_v56, -inf }
 0x31f   : > { %685 = vmax.xlane.f32.xlu1 %v684_v58 }
 0x39c   : > { %v459_v59 = vpop.xlane.xlu1 %458 }
 0x39d   : > { %v460_v60 = vsub.f32 %v456_v43, %v459_v59 }
 0x39f   : > { %v461_v61 = vmul.f32 1.442695, %v460_v60 }
 0x3a1   : > { %1003 = vpow2.f32 %v461_v61 }
 0x3a4   : > { %v574_v62 = vpop.xlane.xlu0 %573 }
 0x3a5   : > { %v575_v63 = vsub.f32 %v571_v49, %v574_v62 }
 0x3a7   : > { %v576_v1 = vmul.f32 1.442695, %v575_v63 }
 0x3a9   : > { %1005 = vpow2.f32 %v576_v1 }
 0x3ab   : > { %v1004_v2 = vpop.eup %1003 }
 0x3ac   : > { %v463_v3 = vsel %vm291_vm1, %v1004_v2, 0.0  ;;  %v686_v7 = vpop.xlane.xlu1 %685 }
 0x3ad   : > { %464 = vadd.xlane.f32.xlu1 %v463_v3  ;;  %v687_v8 = vsub.f32 %v683_v56, %v686_v7 }
 0x3af   : > { %v688_v9 = vmul.f32 1.442695, %v687_v8 }
 0x3b1   : > { %1007 = vpow2.f32 %v688_v9 }
 0x3b3   : > { %v1006_v4 = vpop.eup %1005 }
 0x3b4   : > { %v578_v6 = vsel %vm291_vm1, %v1006_v4, 0.0 }
 0x3b5   : > { %579 = vadd.xlane.f32.xlu0 %v578_v6 }
 0x3bb   : > { %v1008_v10 = vpop.eup %1007 }
 0x3bc   : > { %v690_v11 = vsel %vm291_vm1, %v1008_v10, 0.0 }
 0x3be   : > { %584 = vrot.lane.b32.xlu1 %v892_v5, %s1042_s5 }
 0x3cb   : > { %472 = vrot.lane.b32.xlu0 %v892_v5, %s1041_s30 }
 0x3e2   : > { %691 = vadd.xlane.f32.xlu1 %v690_v11 }
 0x3f3   : > { %696 = vrot.lane.b32.xlu1 %v892_v5, %s1043_s6 }
 0x43a   : > { %v465_v12 = vpop.xlane.xlu1 %464 }
 0x43b   : > { %1009 = vrcp.f32 %v465_v12 }
 0x43e   : > { %v585_v18 = vpop.permute.xlu1 %584 }
 0x43f   : > { %v590_v20 = vsel %vm355_vm2, %v585_v18, 0 }
 0x442   : > { %v580_v13 = vpop.xlane.xlu0 %579 }
 0x443   : > { %1011 = vrcp.f32 %v580_v13 }
 0x445   : > { %v1010_v14 = vpop.eup %1009 }
 0x446   : > { %v467_v15 = vmul.f32 %v1010_v14, %v1004_v2  ;;  %v473_v16 = vpop.permute.xlu0 %472 }
 0x447   : > { %v478_v17 = vsel %vm355_vm2, %v473_v16, 0 }
 0x448   : > { %935 = vmatpush3.bf16.msra.mxu0 %v478_v17  ;;  %v468_v19 = vpack.c.bf16 %v467_v15, %v467_v15 }
 0x449   : > { %946 = vmatprep.subr.bf16.mxu0 %v1039_v0 }
 0x44b   : > { %937 = vmatmul.mubr.msk.bf16.vlgmr.msra.gmra.mrb[4].mxu0 %vm291_vm1, %v468_v19 }
 0x44c   : > { %947 = vmatpush3.bf16.msra.mxu0 %v590_v20  ;;  %948 = vmatprep.mubr.msk.bf16.mxu0 %vm1040_vm0, %v1039_v0 }
 0x44d   : > { %v1012_v21 = vpop.eup %1011  ;;  %958 = vmatprep.subr.bf16.mxu0 %v1039_v0 }
 0x44e   : > { %v582_v22 = vmul.f32 %v1012_v21, %v1006_v4 }
 0x450   : > { %v583_v23 = vpack.c.bf16 %v582_v22, %v582_v22 }
 0x453   : > { %949 = vmatmul.mubr.msk.bf16.vlgmr.msra.gmra.mrb[8].mxu0 %vm291_vm1, %v583_v23 }
 0x454   : > { %960 = vmatprep.mubr.msk.bf16.mxu0 %vm1040_vm0, %v1039_v0 }
 0x46f   : > { %v692_v24 = vpop.xlane.xlu1 %691 }
 0x470   : > { %1013 = vrcp.f32 %v692_v24 }
 0x473   : > { %v697_v25 = vpop.permute.xlu1 %696 }
 0x474   : > { %v702_v26 = vsel %vm355_vm2, %v697_v25, 0 }
 0x475   : > { %959 = vmatpush3.bf16.msra.mxu0 %v702_v26 }
 0x47a   : > { %v1014_v27 = vpop.eup %1013 }
 0x47b   : > { %v694_v28 = vmul.f32 %v1014_v27, %v1008_v10 }
 0x47d   : > { %v695_v29 = vpack.c.bf16 %v694_v28, %v694_v28 }
 0x47f   : > { %961 = vmatmul.mubr.msk.bf16.vlgmr.msra.gmra.mrb[12].mxu0 %vm291_vm1, %v695_v29 }
 0x51e   : > { %v514_v30 = vpop.f32.mrb[4].mxu0 }
 0x51f   : > { %745 = vrot.lane.b32.xlu0 %v514_v30, %s1044_s10  ;;  %v938_v31 = vpop.f32.mrb[5].mxu0 }
 0x520   : > { %v517_v32 = vpop.f32.mrb[6].mxu0 }
 0x521   : > { %v939_v33 = vpop.f32.mrb[7].mxu0 }
 0x526   : > { %v626_v35 = vpop.f32.mrb[8].mxu0 }
 0x527   : > { %749 = vrot.lane.b32.xlu1 %v626_v35, %s1045_s11  ;;  %v950_v0 = vpop.f32.mrb[9].mxu0 }
 0x528   : > { %v629_v36 = vpop.f32.mrb[10].mxu0 }
 0x529   : > { %v951_v37 = vpop.f32.mrb[11].mxu0 }
 0x552   : > { %v738_v38 = vpop.f32.mrb[12].mxu0 }
 0x553   : > { %753 = vrot.lane.b32.xlu0 %v738_v38, %s1046_s12  ;;  %v962_v39 = vpop.f32.mrb[13].mxu0 }
 0x554   : > { %v741_v40 = vpop.f32.mrb[14].mxu0 }
 0x555   : > { %v963_v41 = vpop.f32.mrb[15].mxu0 }
 0x591   : > { %v746_v42 = vpop.permute.xlu0 %745 }
 0x592   : > { %v756_v44 = vsel %vm291_vm1, %v1149_v34, %v746_v42 }
 0x599   : > { %v750_v43 = vpop.permute.xlu1 %749 }
 0x59a   : > { %v758_v45 = vsel %vm757_vm3, %v756_v44, %v750_v43 }
 0x5c5   : > { %v754_v46 = vpop.permute.xlu0 %753 }
 0x5c6   : > { %v760_v47 = vsel %vm759_vm4, %v758_v45, %v754_v46 }
 0x5c7   : > { %v761_v48 = vpack.c.bf16 %v760_v47, %v760_v47 }
 0x5c9   : > { %763 = vst.msk [vmem:[%s285_s15] sm:$0xf] %vm762_vm5, %v761_v48 }
 0x5ca PF: > { %s14_s17 = sadd.s32 1, %s1037_s17   ;;  %s1197_s15 = smov %s1033_s16 }
 0x5cb   : > { %p11_p5 = scmp.ge.s32.totalorder %s14_s17, 4   ;;  %s1198_s16 = smov %s1200_s18 }
 0x5cd   :  { %13 = sbr.rel (!%p11_p5) target bundleno = 2 (0x2), region = 75 }

// kernel: transformer_forward.28
= control target key start
LH: loop header
LB: loop body
LE: loop exit
PB: predicated region body
PF: predicated region fallthrough
CT: control target
= control target key end

     0   :  { %v290_v0 = vmov 0.0   ;;  %vm291_vm0 = vmmov 0   ;;  %vm53_vm1 = vcmask 261120   ;;  %vm140_vm2 = vcmask 523264   ;;  %s381_s1 = inlined_call_operand.vmem [shape: bf16[32,64], index: 1, kind: input, shape index: {}]   ;;  %s382_s0 = inlined_call_operand.vmem [shape: f32[16,32], index: 0, kind: input, shape index: {}]   ;;  %s383_s3 = inlined_call_operand.vmem [shape: bf16[64,32], index: 3, kind: input, shape index: {}]   ;;  %s384_s2 = inlined_call_operand.vmem [shape: f32[1,64], index: 2, kind: input, shape index: {}]   ;;  %s385_s4 = inlined_call_operand.vmem [shape: f32[1,32], index: 4, kind: input, shape index: {}]   ;;  %s386_s5 = inlined_call_operand.vmem [shape: f32[1,32], index: 5, kind: input, shape index: {}]   ;;  %s387_s6 = inlined_call_operand.vmem [shape: f32[1,32], index: 6, kind: input, shape index: {}]   ;;  %s388_s7 = inlined_call_operand.vmem [shape: f32[16,32], index: 7, kind: output, shape index: {}]  }
   0x1   :  { %258 = vmatprep.subr.bf16.mxu0 %v290_v0  ;;  %v280_v1 = vld [vmem:[%s381_s1] sm:$0xff]   ;;  %262 = vmatprep.mubr.msk.bf16.mxu0 %vm291_vm0, %v290_v0  ;;  %v281_v2 = vld [vmem:[%s381_s1 + $0x8] sm:$0xff]   ;;  %v284_v8 = vld [vmem:[%s383_s3 + $0x10] sm:$0xff]  }
   0x2   :  { %266 = vmatprep.subr.bf16.mxu1 %v290_v0  ;;  %274 = vmatprep.mubr.msk.bf16.mxu1 %vm291_vm0, %v290_v0  ;;  %v27_v3 = vld [vmem:[%s382_s0] sm:$0xff]  ;;  %v28_v4 = vld [vmem:[%s382_s0 + $0x8] sm:$0xff]  ;;  %v285_v9 = vld [vmem:[%s383_s3 + $0x18] sm:$0xff]  }
   0x3   :  { %259 = vmatpush3.bf16.msra.mxu0 %v280_v1  ;;  %v282_v5 = vld [vmem:[%s383_s3] sm:$0xff]   ;;  %v283_v6 = vld [vmem:[%s383_s3 + $0x8] sm:$0xff]   ;;  %v29_v7 = vpack.c.bf16 %v28_v4, %v27_v3 }
   0x4   :  { %260 = vmatprep.subr.bf16.mxu0 %v290_v0  ;;  %267 = vmatpush3.bf16.msra.mxu1 %v282_v5  ;;  %v238_v10 = vld [vmem:[%s384_s2] ss:$0 sm:$0xff] }
   0x5   :  { %268 = vmatprep.subr.bf16.mxu1 %v290_v0  ;;  %v242_v20 = vld [vmem:[%s385_s4] ss:$0 sm:$0xff] }
   0x6   :  { %v248_v48 = vld [vmem:[%s386_s5] ss:$0 sm:$0xff] }
   0x7   :  { %261 = vmatpush3.bf16.msra.mxu0 %v281_v2  ;;  %v249_v50 = vld [vmem:[%s387_s6] ss:$0 sm:$0xff] }
   0x8   :  { %269 = vmatpush3.bf16.msra.mxu1 %v283_v6 }
   0x9   :  { %270 = vmatprep.subr.bf16.mxu1 %v290_v0 }
   0xa   :  { %263 = vmatmul.mubr.msk.bf16.vlgmr.msra.gmra.mrb[0].mxu0 %vm53_vm1, %v29_v7 }
   0xc   :  { %271 = vmatpush3.bf16.msra.mxu1 %v284_v8 }
   0xd   :  { %272 = vmatprep.subr.bf16.mxu1 %v290_v0 }
  0x10   :  { %273 = vmatpush3.bf16.msra.mxu1 %v285_v9 }
  0xdd   :  { %v91_v11 = vpop.f32.mrb[0].mxu0 }
  0xde   :  { %v92_v12 = vadd.f32 %v238_v10, %v91_v11  ;;  %v264_v13 = vpop.f32.mrb[1].mxu0 }
  0xdf   :  { %v94_v14 = vpop.f32.mrb[2].mxu0 }
  0xe0   :  { %v95_v15 = vadd.f32 %v238_v10, %v94_v14  ;;  %v265_v16 = vpop.f32.mrb[3].mxu0  ;;  %v98_v17 = vmax.f32 %v92_v12, 0.0 }
  0xe2   :  { %v99_v18 = vmax.f32 %v95_v15, 0.0 }
  0xe4   :  { %v100_v19 = vpack.c.bf16 %v99_v18, %v98_v17 }
  0xe6   :  { %275 = vmatmul.mubr.msk.bf16.vlgmr.msra.gmra.mrb[0].mxu1 %vm140_vm2, %v100_v19 }
 0x1b9   :  { %v178_v21 = vpop.f32.mrb[0].mxu1 }
 0x1ba   :  { %v179_v22 = vadd.f32 %v242_v20, %v178_v21  ;;  %v276_v23 = vpop.f32.mrb[1].mxu1 }
 0x1bb   :  { %v181_v24 = vpop.f32.mrb[2].mxu1 }
 0x1bc   :  { %v182_v25 = vadd.f32 %v242_v20, %v181_v24  ;;  %v277_v26 = vpop.f32.mrb[3].mxu1  ;;  %v185_v27 = vadd.f32 %v179_v22, %v27_v3 }
 0x1be   :  { %v187_v28 = vsel %vm53_vm1, %v185_v27, 0.0  ;;  %v186_v29 = vadd.f32 %v182_v25, %v28_v4 }
 0x1bf   :  { %188 = vadd.xlane.f32.xlu0 %v187_v28 }
 0x1c0   :  { %v190_v30 = vsel %vm53_vm1, %v186_v29, 0.0 }
 0x1c3   :  { %191 = vadd.xlane.f32.xlu0 %v190_v30 }
 0x24c   :  { %v189_v31 = vpop.xlane.xlu0 %188 }
 0x24d   :  { %v194_v32 = vmul.f32 0.03125, %v189_v31 }
 0x24f   :  { %v196_v33 = vsub.f32 %v185_v27, %v194_v32 }
 0x250   :  { %v192_v34 = vpop.xlane.xlu0 %191 }
 0x251   :  { %v195_v35 = vmul.f32 0.03125, %v192_v34  ;;  %v198_v36 = vmul.f32 %v196_v33, %v196_v33 }
 0x253   :  { %v197_v37 = vsub.f32 %v186_v29, %v195_v35  ;;  %v200_v38 = vsel %vm53_vm1, %v198_v36, 0.0 }
 0x254   :  { %201 = vadd.xlane.f32.xlu1 %v200_v38 }
 0x255   :  { %v199_v39 = vmul.f32 %v197_v37, %v197_v37 }
 0x257   :  { %v203_v40 = vsel %vm53_vm1, %v199_v39, 0.0 }
 0x258   :  { %204 = vadd.xlane.f32.xlu1 %v203_v40 }
 0x2e1   :  { %v202_v41 = vpop.xlane.xlu1 %201 }
 0x2e2   :  { %v206_v42 = vmul.f32 0.03125, %v202_v41 }
 0x2e4   :  { %v208_v43 = vadd.f32 1e-05, %v206_v42 }
 0x2e5   :  { %v205_v44 = vpop.xlane.xlu1 %204 }
 0x2e6   :  { %286 = vrsqrt.f32 %v208_v43  ;;  %v207_v45 = vmul.f32 0.03125, %v205_v44 }
 0x2e8   :  { %v209_v46 = vadd.f32 1e-05, %v207_v45 }
 0x2ea   :  { %288 = vrsqrt.f32 %v209_v46 }
 0x2f0   :  { %v287_v47 = vpop.eup %286 }
 0x2f1   :  { %v212_v49 = vmul.f32 %v287_v47, %v196_v33 }
 0x2f3   :  { %v221_v51 = vmul.f32 %v248_v48, %v212_v49 }
 0x2f4   :  { %v289_v52 = vpop.eup %288 }
 0x2f5   :  { %v230_v53 = vadd.f32 %v249_v50, %v221_v51  ;;  %v213_v54 = vmul.f32 %v289_v52, %v197_v37 }
 0x2f7   :  { %232 = vst.msk [vmem:[%s388_s7] sm:$0xff] %vm53_vm1, %v230_v53  ;;  %v222_v55 = vmul.f32 %v248_v48, %v213_v54 }
 0x2f9   :  { %v231_v56 = vadd.f32 %v249_v50, %v222_v55 }
 0x2fb   :  { %233 = vst.msk [vmem:[%s388_s7 + $0x8] sm:$0xff] %vm53_vm1, %v231_v56 }

// kernel: transformer_forward.37
= control target key start
LH: loop header
LB: loop body
LE: loop exit
PB: predicated region body
PF: predicated region fallthrough
CT: control target
= control target key end

     0   :  { %v231_v0 = vmov 0.0   ;;  %vm232_vm0 = vmmov 0   ;;  %vm49_vm1 = vcmask 261120   ;;  %vm102_vm2 = vcmask 257024   ;;  %s308_s1 = inlined_call_operand.vmem [shape: bf16[32,32], index: 1, kind: input, shape index: {}]   ;;  %s309_s2 = inlined_call_operand.vmem [shape: bf16[32,32], index: 2, kind: input, shape index: {}]   ;;  %s310_s0 = inlined_call_operand.vmem [shape: f32[16,32], index: 0, kind: input, shape index: {}]   ;;  %s311_s3 = inlined_call_operand.vmem [shape: f32[1,32], index: 3, kind: input, shape index: {}]   ;;  %s312_s4 = inlined_call_operand.vmem [shape: f32[1,32], index: 4, kind: input, shape index: {}]   ;;  %s313_s5 = inlined_call_operand.vmem [shape: bf16[16,32], index: 5, kind: output, shape index: {0}]   ;;  %s314_s6 = inlined_call_operand.vmem [shape: bf16[16,32], index: 6, kind: output, shape index: {1}]  }
   0x1   :  { %209 = vmatprep.subr.bf16.mxu0 %v231_v0  ;;  %217 = vmatprep.subr.bf16.mxu1 %v231_v0  ;;  %v227_v1 = vld [vmem:[%s308_s1] sm:$0xff]   ;;  %v229_v3 = vld [vmem:[%s308_s1 + $0x8] sm:$0xff]  }
   0x2   :  { %v228_v2 = vld [vmem:[%s309_s2] sm:$0xff]   ;;  %213 = vmatprep.mubr.msk.bf16.mxu0 %vm232_vm0, %v231_v0  ;;  %221 = vmatprep.mubr.msk.bf16.mxu1 %vm232_vm0, %v231_v0  ;;  %v230_v4 = vld [vmem:[%s309_s2 + $0x8] sm:$0xff]  }
   0x3   :  { %210 = vmatpush3.bf16.msra.mxu0 %v227_v1  ;;  %218 = vmatpush3.bf16.msra.mxu1 %v228_v2  ;;  %v23_v5 = vld [vmem:[%s310_s0] sm:$0xff]  ;;  %v24_v6 = vld [vmem:[%s310_s0 + $0x8] sm:$0xff] }
   0x4   :  { %211 = vmatprep.subr.bf16.mxu0 %v231_v0  ;;  %219 = vmatprep.subr.bf16.mxu1 %v231_v0  ;;  %v25_v7 = vpack.c.bf16 %v24_v6, %v23_v5  ;;  %v187_v8 = vld [vmem:[%s311_s3] ss:$0 sm:$0xff] }
   0x5   :  { %v193_v9 = vld [vmem:[%s312_s4] ss:$0 sm:$0xff] }
   0x7   :  { %212 = vmatpush3.bf16.msra.mxu0 %v229_v3  ;;  %220 = vmatpush3.bf16.msra.mxu1 %v230_v4 }
   0xa   :  { %214 = vmatmul.mubr.msk.bf16.vlgmr.msra.gmra.mrb[0].mxu0 %vm49_vm1, %v25_v7  ;;  %222 = vmatmul.mubr.msk.bf16.vlgmr.msra.gmra.mrb[0].mxu1 %vm49_vm1, %v25_v7 }
  0xdd   :  { %v87_v10 = vpop.f32.mrb[0].mxu0  ;;  %v162_v12 = vpop.f32.mrb[0].mxu1 }
  0xde   :  { %v88_v11 = vadd.f32 %v187_v8, %v87_v10  ;;  %v215_v13 = vpop.f32.mrb[1].mxu0  ;;  %v163_v14 = vadd.f32 %v193_v9, %v162_v12  ;;  %v223_v15 = vpop.f32.mrb[1].mxu1 }
  0xdf   :  { %v90_v16 = vpop.f32.mrb[2].mxu0  ;;  %v165_v19 = vpop.f32.mrb[2].mxu1 }
  0xe0   :  { %v199_v17 = vpack.c.bf16 %v88_v11, %v88_v11  ;;  %v91_v18 = vadd.f32 %v187_v8, %v90_v16  ;;  %v216_v20 = vpop.f32.mrb[3].mxu0  ;;  %v201_v21 = vpack.c.bf16 %v163_v14, %v163_v14  ;;  %v166_v22 = vadd.f32 %v193_v9, %v165_v19  ;;  %v224_v23 = vpop.f32.mrb[3].mxu1 }
  0xe2   :  { %103 = vst.msk [vmem:[%s313_s5] sm:$0xf] %vm102_vm2, %v199_v17  ;;  %v200_v24 = vpack.c.bf16 %v91_v18, %v91_v18  ;;  %177 = vst.msk [vmem:[%s314_s6] sm:$0xf] %vm102_vm2, %v201_v21  ;;  %v202_v25 = vpack.c.bf16 %v166_v22, %v166_v22 }
  0xe4   :  { %104 = vst.msk [vmem:[%s313_s5 + $0x4] sm:$0xf] %vm102_vm2, %v200_v24  ;;  %178 = vst.msk [vmem:[%s314_s6 + $0x4] sm:$0xf] %vm102_vm2, %v202_v25 }

// kernel: transformer_forward.49
= control target key start
LH: loop header
LB: loop body
LE: loop exit
PB: predicated region body
PF: predicated region fallthrough
CT: control target
= control target key end

     0   :  { %v172_v1 = vmov 0.0   ;;  %vm173_vm0 = vmmov 0   ;;  %vm20_vm1 = vcmask 130048   ;;  %s230_s0 = inlined_call_operand.vmem [shape: f32[16,32], index: 0, kind: input, shape index: {}]   ;;  %s231_s1 = inlined_call_operand.vmem [shape: bf16[32,16], index: 1, kind: input, shape index: {}]   ;;  %s232_s2 = inlined_call_operand.vmem [shape: f32[1,16], index: 2, kind: input, shape index: {}]   ;;  %s233_s3 = inlined_call_operand.hbm [shape: f32[16,16], index: 3, kind: output, shape index: {}]  }
   0x1   :  { %v146_v0 = vld [vmem:[%s231_s1] sm:$0xff]   ;;  %133 = vmatprep.subr.bf16.mxu0 %v172_v1  ;;  %v147_v2 = vld [vmem:[%s231_s1 + $0x8] sm:$0xff]   ;;  %137 = vmatprep.mubr.msk.bf16.mxu0 %vm173_vm0, %v172_v1 }
   0x2   :  { %134 = vmatpush3.bf16.msra.mxu0 %v146_v0  ;;  %v25_v3 = vld [vmem:[%s230_s0] sm:$0xff]  ;;  %v26_v4 = vld [vmem:[%s230_s0 + $0x8] sm:$0xff] }
   0x3   :  { %8 = vsyncpa [#allocation4], 0  ;;  %135 = vmatprep.subr.bf16.mxu0 %v172_v1  ;;  %21 = vst.msk [vmem:[#allocation2] sm:$0xff] %vm20_vm1, %v172_v1  ;;  %v27_v5 = vpack.c.bf16 %v26_v4, %v25_v3  ;;  %vm44_vm2 = vcmask 261120   ;;  %v129_v14 = vld [vmem:[%s232_s2] ss:$0 sm:$0xff] }
   0x4   :  { %22 = vst.msk [vmem:[#allocation2 + $0x8] sm:$0xff] %vm20_vm1, %v172_v1  ;;  %s174_s20 = smov [#allocation3]  }
   0x5   :  { %s115_s21 = sshll.u32 %s174_s20, 4  ;;  %s116_s21 = int_to_ptr.vmem [resolvable:$true] %s115_s21 }
   0x6   :  { %136 = vmatpush3.bf16.msra.mxu0 %v147_v2  ;;  %s148_s22 = scalar_lea.vmem %s116_s21, 256  ;;  %p153_p1 = scmp.lt.s32.totalorder %s116_s21, %s116_s21 }
   0x7   :  { %p149_p0 = scmp.ne.s32.totalorder %s116_s21, %s148_s22  ;;  %p154_p2 = scmp.lt.s32.totalorder %s148_s22, %s148_s22 }
   0x9   :  { %138 = vmatmul.mubr.msk.bf16.vlgmr.msra.gmra.mrb[0].mxu0 %vm44_vm2, %v27_v5  ;;  %p155_p3 = por %p154_p2, %p153_p1 }
   0xa   :  { %v23_v6 = vld [vmem:[#allocation2] sm:$0xff] }
   0xb   :  { %v24_v8 = vld [vmem:[#allocation2 + $0x8] sm:$0xff]  ;;  %p156_p4 = pnand %p155_p3, %p149_p0 }
  0xdc   :  { %v82_v7 = vpop.f32.mrb[0].mxu0 }
  0xdd   :  { %v89_v9 = vadd.f32 %v82_v7, %v23_v6  ;;  %v139_v10 = vpop.f32.mrb[1].mxu0 }
  0xde   :  { %v85_v11 = vpop.f32.mrb[2].mxu0 }
  0xdf   :  { %92 = vst.msk [vmem:[#allocation2] sm:$0xff] %vm20_vm1, %v89_v9  ;;  %v90_v12 = vadd.f32 %v85_v11, %v24_v8  ;;  %v140_v13 = vpop.f32.mrb[3].mxu0 }
  0xe1   :  { %93 = vst.msk [vmem:[#allocation2 + $0x8] sm:$0xff] %vm20_vm1, %v90_v12 }
  0xe6   :  { %v97_v15 = vld [vmem:[#allocation2] sm:$0xff] }
  0xe7   :  { %v106_v16 = vadd.f32 %v129_v14, %v97_v15 }
  0xe8   :  { %v98_v17 = vld [vmem:[#allocation2 + $0x8] sm:$0xff] }
  0xe9   :  { %v107_v18 = vadd.f32 %v129_v14, %v98_v17  ;;  %108 = vst.msk [vmem:[#allocation3] sm:$0xff] %vm20_vm1, %v106_v16 }
  0xeb   :  { %109 = vst.msk [vmem:[#allocation3 + $0x8] sm:$0xff] %vm20_vm1, %v107_v18 }
  0xec   :  { %159 = shalt.err (!%p156_p4)
}
  0xed   :  { %s160_s24 = scalar_lea.hbm %s233_s3, 256 }
  0xee   :  { %p161_p5 = scmp.ne.s32.totalorder %s233_s3, %s160_s24  ;;  %p164_p6 = scmp.lt.u32.totalorder %s160_s24, %s233_s3 }
  0xf0   :  { %p166_p7 = pnand %p164_p6, %p161_p5 }
  0xf2   :  { %169 = shalt.err (!%p166_p7)
}
  0xf3   :  { %s175_s29 = smov 128   ;;  %s176_s30 = smov 8  }
  0xf4   :  { %121 = dma.vmem_to_hbm [thread:$0]  %s116_s21, 256, %s233_s3, [#allocation4], %s175_s29, %s175_s29, %s176_s30  }
  0xf5   :  { %170 = dma.done.wait [#allocation4], 256  }
  0xf6   :  { %171 = vsyncadd [#allocation4], 4294967040 }
  0xf7   :  { %125 = vsyncpa [#allocation4], 1 }

// kernel: transformer_forward.36
= control target key start
LH: loop header
LB: loop body
LE: loop exit
PB: predicated region body
PF: predicated region fallthrough
CT: control target
= control target key end

     0   :  { %v124_v0 = vmov 0.0   ;;  %vm125_vm0 = vmmov 0   ;;  %vm41_vm1 = vcmask 261120   ;;  %vm94_vm2 = vcmask 257024   ;;  %s167_s1 = inlined_call_operand.vmem [shape: bf16[32,32], index: 1, kind: input, shape index: {}]   ;;  %s168_s0 = inlined_call_operand.vmem [shape: f32[16,32], index: 0, kind: input, shape index: {}]   ;;  %s169_s2 = inlined_call_operand.vmem [shape: f32[1,32], index: 2, kind: input, shape index: {}]   ;;  %s170_s3 = inlined_call_operand.vmem [shape: bf16[16,32], index: 3, kind: output, shape index: {}]  }
   0x1   :  { %112 = vmatprep.subr.bf16.mxu0 %v124_v0  ;;  %v122_v1 = vld [vmem:[%s167_s1] sm:$0xff]   ;;  %116 = vmatprep.mubr.msk.bf16.mxu0 %vm125_vm0, %v124_v0  ;;  %v123_v2 = vld [vmem:[%s167_s1 + $0x8] sm:$0xff]  }
   0x2   :  { %113 = vmatpush3.bf16.msra.mxu0 %v122_v1  ;;  %v15_v3 = vld [vmem:[%s168_s0] sm:$0xff]  ;;  %v16_v4 = vld [vmem:[%s168_s0 + $0x8] sm:$0xff] }
   0x3   :  { %114 = vmatprep.subr.bf16.mxu0 %v124_v0  ;;  %v17_v5 = vpack.c.bf16 %v16_v4, %v15_v3  ;;  %v101_v6 = vld [vmem:[%s169_s2] ss:$0 sm:$0xff] }
   0x6   :  { %115 = vmatpush3.bf16.msra.mxu0 %v123_v2 }
   0x9   :  { %117 = vmatmul.mubr.msk.bf16.vlgmr.msra.gmra.mrb[0].mxu0 %vm41_vm1, %v17_v5 }
  0xdc   :  { %v79_v7 = vpop.f32.mrb[0].mxu0 }
  0xdd   :  { %v80_v8 = vadd.f32 %v101_v6, %v79_v7  ;;  %v118_v9 = vpop.f32.mrb[1].mxu0 }
  0xde   :  { %v82_v10 = vpop.f32.mrb[2].mxu0 }
  0xdf   :  { %v107_v11 = vpack.c.bf16 %v80_v8, %v80_v8  ;;  %v83_v12 = vadd.f32 %v101_v6, %v82_v10  ;;  %v119_v13 = vpop.f32.mrb[3].mxu0 }
  0xe1   :  { %95 = vst.msk [vmem:[%s170_s3] sm:$0xf] %vm94_vm2, %v107_v11  ;;  %v108_v14 = vpack.c.bf16 %v83_v12, %v83_v12 }
  0xe3   :  { %96 = vst.msk [vmem:[%s170_s3 + $0x4] sm:$0xf] %vm94_vm2, %v108_v14 }

</bundles_post_ra>
